<compile_context>
chip_gen: v5e
topology: v5e:2x2
jax: 0.10.0
libtpu: 0.0.40
codegen_flags: <defaults>
</compile_context>

<pallas_src>
import jax
import jax.numpy as jnp
from jax.experimental import pallas as pl
from jax.experimental.pallas import tpu as pltpu

LANE = 128        # hidden feature dims are zero-padded to this (exact for Linear+ReLU)
TILE_B = 512      # max batch rows per grid step (sweep 512-1024; VMEM cost is tiny)


def mlp_kernel(x_ref, w_in_ref, w_mid_ref, w_out_ref, b_hid_ref, b_out_ref, o_ref):
    """4-layer MLP on one (tile_b, d_in) activation tile.

    x_ref:     (tile_b, d_in)  bf16/f32  activation tile (pipelined over grid)
    w_in_ref:  (d_in, LANE)    bf16      layer-0 weight (N zero-padded)
    w_mid_ref: (2, LANE, LANE) bf16      layers 1-2 weights (zero-padded)
    w_out_ref: (LANE, d_out)   bf16      output-layer weight (K zero-padded)
    b_hid_ref: (3, LANE)       f32       hidden-layer biases (zero-padded)
    b_out_ref: (1, d_out)      f32       output-layer bias
    o_ref:     (tile_b, d_out) f32       output tile (narrow, lane-masked store;
                                         HBM write is contiguous since the block
                                         spans the full last dim)
    """
    b_hid = b_hid_ref[...]                              # (3, LANE) f32, tiny
    h = x_ref[...].astype(jnp.bfloat16)                 # no-op if x already bf16

    # Layer 0: (tile_b, d_in) x (d_in, LANE)
    acc = jnp.dot(h, w_in_ref[...], preferred_element_type=jnp.float32)
    h = jnp.maximum(acc + b_hid[0:1, :], 0.0).astype(jnp.bfloat16)

    # Layers 1, 2: (tile_b, LANE) x (LANE, LANE)
    for l in range(2):
        acc = jnp.dot(h, w_mid_ref[l], preferred_element_type=jnp.float32)
        h = jnp.maximum(acc + b_hid[l + 1:l + 2, :], 0.0).astype(jnp.bfloat16)

    # Output layer: (tile_b, LANE) x (LANE, d_out), no activation.
    out = jnp.dot(h, w_out_ref[...], preferred_element_type=jnp.float32)
    o_ref[...] = (out + b_out_ref[...]).astype(o_ref.dtype)


def pack_params(params):
    """Pack (w1,b1,...,w4,b4) into kernel-ready, zero-padded slabs.

    Weights are in [in, out] layout (x @ W + b).  Zero-padding hidden dims to
    LANE is numerically exact for a Linear+ReLU stack.
    """
    w1, b1, w2, b2, w3, b3, w4, b4 = params
    d_in, h1 = w1.shape
    h3, d_out = w4.shape
    assert max(h1, w2.shape[1], h3) <= LANE and d_out <= LANE, \
        "hidden/output dims must be <= 128 for this packing"

    def pad2(w, rows, cols):
        return jnp.pad(w, ((0, rows - w.shape[0]), (0, cols - w.shape[1])))

    w_in = pad2(w1, d_in, LANE).astype(jnp.bfloat16)                    # (d_in, LANE)
    w_mid = jnp.stack([pad2(w2, LANE, LANE),
                       pad2(w3, LANE, LANE)]).astype(jnp.bfloat16)      # (2, LANE, LANE)
    w_out = pad2(w4, LANE, d_out).astype(jnp.bfloat16)                  # (LANE, d_out)
    b_hid = jnp.stack([jnp.pad(b, (0, LANE - b.shape[0]))
                       for b in (b1, b2, b3)]).astype(jnp.float32)      # (3, LANE)
    b_out = jnp.reshape(b4, (1, d_out)).astype(jnp.float32)             # (1, d_out)
    return w_in, w_mid, w_out, b_hid, b_out


@jax.jit
def net1_forward(x, w_in, w_mid, w_out, b_hid, b_out):
    """x: [B, input_dim] (bf16 preferred); packed params from pack_params."""
    B, d_in = x.shape
    H = w_in.shape[1]
    d_out = w_out.shape[1]

    # Small batches: one full-array block (legal: block dim == array dim).
    # Large batches: 512-row tiles; ragged last tile handled by Pallas
    # partial-block semantics (no jnp.pad HBM copy).
    tile_b = B if B <= TILE_B else TILE_B
    n_tiles = pl.cdiv(B, tile_b)

    return pl.pallas_call(
        mlp_kernel,
        out_shape=jax.ShapeDtypeStruct((B, d_out), jnp.float32),
        grid=(n_tiles,),
        in_specs=[
            # activations: one (tile_b, d_in) tile per grid step (pipelined)
            pl.BlockSpec((tile_b, d_in), lambda i: (i, 0)),
            # packed weights / biases: constant block index -> fetched once,
            # VMEM-resident across all grid steps
            pl.BlockSpec((d_in, H), lambda i: (0, 0)),
            pl.BlockSpec((2, H, H), lambda i: (0, 0, 0)),
            pl.BlockSpec((H, d_out), lambda i: (0, 0)),
            pl.BlockSpec((3, H), lambda i: (0, 0)),
            pl.BlockSpec((1, d_out), lambda i: (0, 0)),
        ],
        out_specs=pl.BlockSpec((tile_b, d_out), lambda i: (i, 0)),
        compiler_params=pltpu.CompilerParams(
            dimension_semantics=("parallel",),    # megacore sharding on v7x
            vmem_limit_bytes=32 * 1024 * 1024,    # safe on v7x's 64 MiB VMEM
        ),
    )(x, w_in, w_mid, w_out, b_hid, b_out)


def init_params(key, input_dim, h1, h2, h3, output_dim):
    """Deterministic init mimicking PyTorch nn.Linear's U(-1/sqrt(fan_in), +)."""
    dims = [(input_dim, h1), (h1, h2), (h2, h3), (h3, output_dim)]
    params = []
    for fan_in, fan_out in dims:
        key, kw, kb = jax.random.split(key, 3)
        bound = 1.0 / jnp.sqrt(fan_in)
        w = jax.random.uniform(kw, (fan_in, fan_out), jnp.float32, -bound, bound)
        b = jax.random.uniform(kb, (fan_out,), jnp.float32, -bound, bound)
        params.extend([w, b])
    return tuple(params)


def net1_reference_bf16(x, params):
    """Pure-JAX reference with the same bf16 matmul-operand quantization."""
    w1, b1, w2, b2, w3, b3, w4, b4 = params

    def lin(h, w, b):
        return jnp.dot(h.astype(jnp.bfloat16), w.astype(jnp.bfloat16),
                       preferred_element_type=jnp.float32) + b

    h = jnp.maximum(lin(x, w1, b1), 0.0)
    h = jnp.maximum(lin(h, w2, b2), 0.0)
    h = jnp.maximum(lin(h, w3, b3), 0.0)
    return lin(h, w4, b4)


def net1_reference_f32(x, params):
    """Full-f32 reference matching the PyTorch module exactly."""
    w1, b1, w2, b2, w3, b3, w4, b4 = params
    h = jnp.maximum(x @ w1 + b1, 0.0)
    h = jnp.maximum(h @ w2 + b2, 0.0)
    h = jnp.maximum(h @ w3 + b3, 0.0)
    return h @ w4 + b4


if __name__ == "__main__":
    input_dim, hidden_dim_1, hidden_dim_2, hidden_dim_3, output_dim = 32, 64, 64, 32, 16

    key = jax.random.PRNGKey(0)
    key, kx = jax.random.split(key)
    params = init_params(key, input_dim, hidden_dim_1, hidden_dim_2,
                         hidden_dim_3, output_dim)
    packed = pack_params(params)

    # Two small batches: one that divides TILE_B evenly (2-step grid, even for
    # v7x megacore) and one ragged batch exercising the partial last tile.
    for B in (1024, 1000):
        kx_b = jax.random.fold_in(kx, B)
        x_f32 = jax.random.normal(kx_b, (B, input_dim), jnp.float32)
        x_bf16 = x_f32.astype(jnp.bfloat16)   # activations transported as bf16

        out = net1_forward(x_bf16, *packed)
        out = jax.block_until_ready(out)
        assert out.shape == (B, output_dim)

        # Exact-numerics check vs a reference with matching bf16 operands.
        ref_bf16 = net1_reference_bf16(x_bf16, params)
        assert jnp.allclose(out, ref_bf16, atol=2e-3, rtol=2e-3), \
            f"B={B}: mismatch vs bf16-operand reference"

        # Loose check vs the exact f32 (PyTorch-equivalent) forward.
        ref_f32 = net1_reference_f32(x_f32, params)
        assert jnp.allclose(out, ref_f32, atol=1e-1, rtol=1e-1), \
            f"B={B}: mismatch vs f32 reference beyond bf16 tolerance"

    print("KERNEL_OK")
</pallas_src>

<mosaic_0001>
module attributes {stable_mosaic.version = 11 : i64} {
  func.func @mlp_kernel(%arg0: i32, %arg1: memref<512x32xbf16, #tpu.memory_space<vmem>>, %arg2: memref<32x128xbf16, #tpu.memory_space<vmem>>, %arg3: memref<2x128x128xbf16, #tpu.memory_space<vmem>>, %arg4: memref<128x16xbf16, #tpu.memory_space<vmem>>, %arg5: memref<3x128xf32, #tpu.memory_space<vmem>>, %arg6: memref<1x16xf32, #tpu.memory_space<vmem>>, %arg7: memref<512x16xf32, #tpu.memory_space<vmem>>) attributes {dimension_semantics = [#tpu.dimension_semantics<parallel>], iteration_bounds = array<i64: 2>, scalar_prefetch = 0 : i64, scratch_operands = 0 : i64, tpu.core_type = #tpu.core_type<tc>, window_params = [{transform_indices = @transform_0, window_bounds = array<i64: 512, 32>}, {pipeline_mode = #tpu.pipeline_mode<synchronous>, transform_indices = @transform_1, window_bounds = array<i64: 32, 128>}, {pipeline_mode = #tpu.pipeline_mode<synchronous>, transform_indices = @transform_2, window_bounds = array<i64: 2, 128, 128>}, {pipeline_mode = #tpu.pipeline_mode<synchronous>, transform_indices = @transform_3, window_bounds = array<i64: 128, 16>}, {pipeline_mode = #tpu.pipeline_mode<synchronous>, transform_indices = @transform_4, window_bounds = array<i64: 3, 128>}, {pipeline_mode = #tpu.pipeline_mode<synchronous>, transform_indices = @transform_5, window_bounds = array<i64: 1, 16>}, {transform_indices = @transform_6, window_bounds = array<i64: 512, 16>}]} {
    %c0 = arith.constant 0 : index
    %c0_0 = arith.constant 0 : index
    %0 = vector.load %arg5[%c0, %c0_0] : memref<3x128xf32, #tpu.memory_space<vmem>>, vector<3x128xf32>
    %c0_1 = arith.constant 0 : index
    %c0_2 = arith.constant 0 : index
    %1 = vector.load %arg1[%c0_1, %c0_2] : memref<512x32xbf16, #tpu.memory_space<vmem>>, vector<512x32xbf16>
    %c0_3 = arith.constant 0 : index
    %c0_4 = arith.constant 0 : index
    %2 = vector.load %arg2[%c0_3, %c0_4] : memref<32x128xbf16, #tpu.memory_space<vmem>>, vector<32x128xbf16>
    %cst = arith.constant dense<0.000000e+00> : vector<512x128xf32>
    %3 = tpu.matmul %1, %2, %cst {dimension_numbers = #tpu.dot_dimension_numbers<[1], [0], [0], [1], [0, 0, 1, 1], [], []>} : vector<512x32xbf16>, vector<32x128xbf16>, vector<512x128xf32> -> vector<512x128xf32>
    %4 = vector.extract_strided_slice %0 {offsets = [0, 0], sizes = [1, 128], strides = [1, 1]} : vector<3x128xf32> to vector<1x128xf32>
    %5 = vector.broadcast %4 : vector<1x128xf32> to vector<512x128xf32>
    %6 = arith.addf %3, %5 : vector<512x128xf32>
    %cst_5 = arith.constant 0.000000e+00 : f32
    %7 = vector.broadcast %cst_5 : f32 to vector<512x128xf32>
    %8 = arith.maximumf %6, %7 : vector<512x128xf32>
    %9 = arith.truncf %8 : vector<512x128xf32> to vector<512x128xbf16>
    %c0_6 = arith.constant 0 : index
    %c0_7 = arith.constant 0 : index
    %c0_8 = arith.constant 0 : index
    %10 = vector.load %arg3[%c0_6, %c0_7, %c0_8] : memref<2x128x128xbf16, #tpu.memory_space<vmem>>, vector<1x128x128xbf16>
    %11 = vector.shape_cast %10 : vector<1x128x128xbf16> to vector<128x128xbf16>
    %cst_9 = arith.constant dense<0.000000e+00> : vector<512x128xf32>
    %12 = tpu.matmul %9, %11, %cst_9 {dimension_numbers = #tpu.dot_dimension_numbers<[1], [0], [0], [1], [0, 0, 1, 1], [], []>} : vector<512x128xbf16>, vector<128x128xbf16>, vector<512x128xf32> -> vector<512x128xf32>
    %13 = vector.extract_strided_slice %0 {offsets = [1, 0], sizes = [1, 128], strides = [1, 1]} : vector<3x128xf32> to vector<1x128xf32>
    %14 = vector.broadcast %13 : vector<1x128xf32> to vector<512x128xf32>
    %15 = arith.addf %12, %14 : vector<512x128xf32>
    %cst_10 = arith.constant 0.000000e+00 : f32
    %16 = vector.broadcast %cst_10 : f32 to vector<512x128xf32>
    %17 = arith.maximumf %15, %16 : vector<512x128xf32>
    %18 = arith.truncf %17 : vector<512x128xf32> to vector<512x128xbf16>
    %c1 = arith.constant 1 : index
    %c0_11 = arith.constant 0 : index
    %c0_12 = arith.constant 0 : index
    %19 = vector.load %arg3[%c1, %c0_11, %c0_12] : memref<2x128x128xbf16, #tpu.memory_space<vmem>>, vector<1x128x128xbf16>
    %20 = vector.shape_cast %19 : vector<1x128x128xbf16> to vector<128x128xbf16>
    %cst_13 = arith.constant dense<0.000000e+00> : vector<512x128xf32>
    %21 = tpu.matmul %18, %20, %cst_13 {dimension_numbers = #tpu.dot_dimension_numbers<[1], [0], [0], [1], [0, 0, 1, 1], [], []>} : vector<512x128xbf16>, vector<128x128xbf16>, vector<512x128xf32> -> vector<512x128xf32>
    %22 = vector.extract_strided_slice %0 {offsets = [2, 0], sizes = [1, 128], strides = [1, 1]} : vector<3x128xf32> to vector<1x128xf32>
    %23 = vector.broadcast %22 : vector<1x128xf32> to vector<512x128xf32>
    %24 = arith.addf %21, %23 : vector<512x128xf32>
    %cst_14 = arith.constant 0.000000e+00 : f32
    %25 = vector.broadcast %cst_14 : f32 to vector<512x128xf32>
    %26 = arith.maximumf %24, %25 : vector<512x128xf32>
    %27 = arith.truncf %26 : vector<512x128xf32> to vector<512x128xbf16>
    %c0_15 = arith.constant 0 : index
    %c0_16 = arith.constant 0 : index
    %28 = vector.load %arg4[%c0_15, %c0_16] : memref<128x16xbf16, #tpu.memory_space<vmem>>, vector<128x16xbf16>
    %cst_17 = arith.constant dense<0.000000e+00> : vector<512x16xf32>
    %29 = tpu.matmul %27, %28, %cst_17 {dimension_numbers = #tpu.dot_dimension_numbers<[1], [0], [0], [1], [0, 0, 1, 1], [], []>} : vector<512x128xbf16>, vector<128x16xbf16>, vector<512x16xf32> -> vector<512x16xf32>
    %c0_18 = arith.constant 0 : index
    %c0_19 = arith.constant 0 : index
    %30 = vector.load %arg6[%c0_18, %c0_19] : memref<1x16xf32, #tpu.memory_space<vmem>>, vector<1x16xf32>
    %31 = vector.broadcast %30 : vector<1x16xf32> to vector<512x16xf32>
    %32 = arith.addf %29, %31 : vector<512x16xf32>
    %c0_20 = arith.constant 0 : index
    %c0_21 = arith.constant 0 : index
    %33 = vector.load %arg7[%c0_20, %c0_21] : memref<512x16xf32, #tpu.memory_space<vmem>>, vector<512x16xf32>
    tpu.vector_store %arg7[%c0_20, %c0_21], %32 {strides = array<i32>} : memref<512x16xf32, #tpu.memory_space<vmem>>, vector<512x16xf32>,
    return
  }
  func.func @transform_0(%arg0: i32) -> (i32, i32) {
    %c0_i32 = arith.constant 0 : i32
    %c0_i32_0 = arith.constant 0 : i32
    return %arg0, %c0_i32 : i32, i32
  }
  func.func @transform_1(%arg0: i32) -> (i32, i32) {
    %c0_i32 = arith.constant 0 : i32
    %c0_i32_0 = arith.constant 0 : i32
    %c0_i32_1 = arith.constant 0 : i32
    return %c0_i32, %c0_i32_0 : i32, i32
  }
  func.func @transform_2(%arg0: i32) -> (i32, i32, i32) {
    %c0_i32 = arith.constant 0 : i32
    %c0_i32_0 = arith.constant 0 : i32
    %c0_i32_1 = arith.constant 0 : i32
    %c0_i32_2 = arith.constant 0 : i32
    return %c0_i32, %c0_i32_0, %c0_i32_1 : i32, i32, i32
  }
  func.func @transform_3(%arg0: i32) -> (i32, i32) {
    %c0_i32 = arith.constant 0 : i32
    %c0_i32_0 = arith.constant 0 : i32
    %c0_i32_1 = arith.constant 0 : i32
    return %c0_i32, %c0_i32_0 : i32, i32
  }
  func.func @transform_4(%arg0: i32) -> (i32, i32) {
    %c0_i32 = arith.constant 0 : i32
    %c0_i32_0 = arith.constant 0 : i32
    %c0_i32_1 = arith.constant 0 : i32
    return %c0_i32, %c0_i32_0 : i32, i32
  }
  func.func @transform_5(%arg0: i32) -> (i32, i32) {
    %c0_i32 = arith.constant 0 : i32
    %c0_i32_0 = arith.constant 0 : i32
    %c0_i32_1 = arith.constant 0 : i32
    return %c0_i32, %c0_i32_0 : i32, i32
  }
  func.func @transform_6(%arg0: i32) -> (i32, i32) {
    %c0_i32 = arith.constant 0 : i32
    %c0_i32_0 = arith.constant 0 : i32
    return %arg0, %c0_i32 : i32, i32
  }
}

</mosaic_0001>

<bundles_post_ra>
// kernel: net1_forward.1
= control target key start
LH: loop header
LB: loop body
LE: loop exit
PB: predicated region body
PF: predicated region fallthrough
CT: control target
= control target key end

     0   :  { %s2281_s21 = smov 0   ;;  %s2848_s0 = inlined_call_operand.vmem [shape: bf16[1024,32], index: 0, kind: input, shape index: {}]   ;;  %s2849_s1 = inlined_call_operand.vmem [shape: bf16[32,128], index: 1, kind: input, shape index: {}]   ;;  %s2850_s2 = inlined_call_operand.vmem [shape: bf16[2,128,128], index: 2, kind: input, shape index: {}]   ;;  %s2851_s3 = inlined_call_operand.vmem [shape: bf16[128,16], index: 3, kind: input, shape index: {}]   ;;  %s2852_s4 = inlined_call_operand.vmem [shape: f32[3,128], index: 4, kind: input, shape index: {}]   ;;  %s2853_s5 = inlined_call_operand.vmem [shape: f32[1,16], index: 5, kind: input, shape index: {}]   ;;  %s2854_s6 = inlined_call_operand.vmem [shape: f32[1024,16], index: 6, kind: output, shape index: {}]  }
   0x1 LB: > { %s1879_s22 = sadd.s32 4294967295, %s2244_s21   ;;  %p1883_p0 = scmp.ge.s32.totalorder %s2244_s21, 1  ;;  %s2244_s21 = sphi %s2281_s21, %s16_s21  }
   0x2   : > { %p213_p1 = scmp.lt.s32.totalorder %s2244_s21, 3 }
   0x4   : > { %p214_p2 = pnand %p1883_p0, %p213_p1 }
   0x5   : > { %s1884_s25 = sshll.u32 (!%p214_p2), %s1879_s22, 6 }
   0x6   : > { %217 = sbr.rel (%p214_p2) target bundleno = 1084 (0x43c), region = 44  ;;  %p244_p3 = scmp.lt.s32.totalorder (!%p214_p2), %s1884_s25, 127 }
   0xb   : > { %v2203_v0 = vld [vmem:[%s2849_s1 + $0x8] sm:$0xff]  ;;  %v2202_v1 = vld [vmem:[%s2849_s1] sm:$0xff]  ;;  %s2856_s25 = smov (!%p244_p3, %s1884_s25), 127  ;;  %vm498_vm0 = vcmask 261120   ;;  %v2211_v7 = vld [vmem:[%s2850_s2 + $0x38] sm:$0xff]  ;;  %vm1758_vm1 = vcmask 130048  }
   0xc   : > { %601 = vmatpush.bf16.msra.mxu0 %v2203_v0  ;;  %s1885_s28 = sshll.u32 %s2856_s25, 2  ;;  %925 = vmatpush.bf16.msra.mxu1 %v2211_v7  ;;  %v2210_v9 = vld [vmem:[%s2850_s2 + $0x30] sm:$0xff]  ;;  %v2209_v10 = vld [vmem:[%s2850_s2 + $0x28] sm:$0xff]  ;;  %v2208_v11 = vld [vmem:[%s2850_s2 + $0x20] sm:$0xff] }
   0xd   : > { %s2301_s7 = scalar_lea.vmem %s2848_s0, %s1885_s28  ;;  %v2207_v12 = vld [vmem:[%s2850_s2 + $0x18] sm:$0xff]  ;;  %v2206_v14 = vld [vmem:[%s2850_s2 + $0x10] sm:$0xff]  ;;  %v2205_v15 = vld [vmem:[%s2850_s2 + $0x8] sm:$0xff] }
   0xe   : > { %v2170_v2 = vld [vmem:[%s2301_s7] sm:$0xff]  ;;  %v2171_v3 = vld [vmem:[%s2301_s7 + $0x8] sm:$0xff]  ;;  %v2172_v4 = vld [vmem:[%s2301_s7 + $0x10] sm:$0xff] }
   0xf   : > { %v2173_v5 = vld [vmem:[%s2301_s7 + $0x18] sm:$0xff]  ;;  %v2174_v6 = vld [vmem:[%s2301_s7 + $0x20] sm:$0xff]  ;;  %v2175_v8 = vld [vmem:[%s2301_s7 + $0x28] sm:$0xff] }
  0x10   : > { %602 = vmatpush.bf16.msra.mxu0 %v2202_v1  ;;  %926 = vmatpush.bf16.msra.mxu1 %v2210_v9  ;;  %v2176_v13 = vld [vmem:[%s2301_s7 + $0x30] sm:$0xff]  ;;  %v2204_v16 = vld [vmem:[%s2850_s2] sm:$0xff]  ;;  %v2177_v17 = vld [vmem:[%s2301_s7 + $0x38] sm:$0xff] }
  0x11   : > { %v2178_v18 = vld [vmem:[%s2301_s7 + $0x40] sm:$0xff]  ;;  %v2179_v28 = vld [vmem:[%s2301_s7 + $0x48] sm:$0xff]  ;;  %v2180_v36 = vld [vmem:[%s2301_s7 + $0x50] sm:$0xff] }
  0x12   : > { %v2347_v19 = vld [vmem:[%s2852_s4] sm:$0x7]  ;;  %v2181_v44 = vld [vmem:[%s2301_s7 + $0x58] sm:$0xff]  ;;  %v2183_v60 = vld [vmem:[%s2301_s7 + $0x68] sm:$0xff] }
  0x13   : > { %2024 = vmatmul.msk.bf16.vlgmr.msra.gmra.mxu0 %vm498_vm0, %v2170_v2  ;;  %v2350_v21 = vperm.slane %v2347_v19, 0  ;;  %v2182_v52 = vld [vmem:[%s2301_s7 + $0x60] sm:$0xff]  ;;  %v2219_v1 = vld [vmem:[%s2850_s2 + $0x78] sm:$0xff] }
  0x14   : > { %927 = vmatpush.bf16.msra.mxu1 %v2209_v10  ;;  %1256 = vmatpush.bf16.msra.mxu2 %v2219_v1  ;;  %v2216_v9 = vld [vmem:[%s2850_s2 + $0x60] sm:$0xff] }
  0x18   : > { %928 = vmatpush.bf16.msra.mxu1 %v2208_v11 }
  0x1c   : > { %929 = vmatpush.bf16.msra.mxu1 %v2207_v12 }
  0x20   : > { %930 = vmatpush.bf16.msra.mxu1 %v2206_v14 }
  0x23   : > { %2025 = vmatmul.msk.bf16.gmra.mxu0 %vm498_vm0, %v2171_v3 }
  0x24   : > { %931 = vmatpush.bf16.msra.mxu1 %v2205_v15 }
  0x28   : > { %932 = vmatpush.bf16.msra.mxu1 %v2204_v16 }
  0x33   : > { %2026 = vmatmul.msk.bf16.gmra.mxu0 %vm498_vm0, %v2172_v4 }
  0x43   : > { %2027 = vmatmul.msk.bf16.gmra.mxu0 %vm498_vm0, %v2173_v5  ;;  %v2218_v5 = vld [vmem:[%s2850_s2 + $0x70] sm:$0xff] }
  0x44   : > { %1257 = vmatpush.bf16.msra.mxu2 %v2218_v5 }
  0x53   : > { %2028 = vmatmul.msk.bf16.gmra.mxu0 %vm498_vm0, %v2174_v6  ;;  %v2184_v6 = vld [vmem:[%s2301_s7 + $0x70] sm:$0xff] }
  0x63   : > { %2029 = vmatmul.msk.bf16.gmra.mxu0 %vm498_vm0, %v2175_v8  ;;  %v2217_v8 = vld [vmem:[%s2850_s2 + $0x68] sm:$0xff] }
  0x64   : > { %1258 = vmatpush.bf16.msra.mxu2 %v2217_v8 }
  0x68   : > { %1259 = vmatpush.bf16.msra.mxu2 %v2216_v9 }
  0x73   : > { %2030 = vmatmul.msk.bf16.gmra.mxu0 %vm498_vm0, %v2176_v13  ;;  %v2215_v13 = vld [vmem:[%s2850_s2 + $0x58] sm:$0xff] }
  0x74   : > { %1260 = vmatpush.bf16.msra.mxu2 %v2215_v13 }
  0x83   : > { %2031 = vmatmul.msk.bf16.gmra.mxu0 %vm498_vm0, %v2177_v17  ;;  %v2214_v17 = vld [vmem:[%s2850_s2 + $0x50] sm:$0xff] }
  0x84   : > { %1261 = vmatpush.bf16.msra.mxu2 %v2214_v17 }
  0x90   : > { %v604_v20 = vpop.f32.mrf.mxu0 }
  0x91   : > { %v605_v22 = vadd.f32 %v604_v20, %v2350_v21 }
  0x93   : > { %2032 = vmatmul.msk.bf16.gmra.mxu0 %vm498_vm0, %v2178_v18  ;;  %v764_v25 = vmax.f32 %v605_v22, 0.0  ;;  %v2185_v18 = vld [vmem:[%s2301_s7 + $0x78] sm:$0xff]  ;;  %v2213_v22 = vld [vmem:[%s2850_s2 + $0x48] sm:$0xff] }
  0x94   : > { %1262 = vmatpush.bf16.msra.mxu2 %v2213_v22 }
  0x98   : > { %v606_v23 = vpop.f32.mrf.mxu0 }
  0x99   : > { %v607_v24 = vadd.f32 %v606_v23, %v2350_v21  ;;  %v2212_v23 = vld [vmem:[%s2850_s2 + $0x40] sm:$0xff] }
  0x9a   : > { %1263 = vmatpush.bf16.msra.mxu2 %v2212_v23  ;;  %v2190_v23 = vld [vmem:[%s2301_s7 + $0xa0] sm:$0xff] }
  0x9b   : > { %v765_v26 = vmax.f32 %v607_v24, 0.0 }
  0x9d   : > { %v828_v27 = vpack.c.bf16 %v765_v26, %v764_v25 }
  0x9f   : > { %933 = vmatmul.bf16.vlgmr.msra.gmra.mxu1 %v828_v27 }
  0xa0   : > { %v609_v29 = vpop.f32.mrf.mxu0 }
  0xa1   : > { %v610_v30 = vadd.f32 %v609_v29, %v2350_v21 }
  0xa3   : > { %2033 = vmatmul.msk.bf16.gmra.mxu0 %vm498_vm0, %v2179_v28  ;;  %v766_v33 = vmax.f32 %v610_v30, 0.0  ;;  %v2186_v30 = vld [vmem:[%s2301_s7 + $0x80] sm:$0xff] }
  0xa8   : > { %v611_v31 = vpop.f32.mrf.mxu0 }
  0xa9   : > { %v612_v32 = vadd.f32 %v611_v31, %v2350_v21 }
  0xab   : > { %v767_v34 = vmax.f32 %v612_v32, 0.0 }
  0xad   : > { %v829_v35 = vpack.c.bf16 %v767_v34, %v766_v33 }
  0xaf   : > { %938 = vmatmul.bf16.gmra.mxu1 %v829_v35 }
  0xb0   : > { %v614_v37 = vpop.f32.mrf.mxu0 }
  0xb1   : > { %v615_v38 = vadd.f32 %v614_v37, %v2350_v21 }
  0xb3   : > { %2034 = vmatmul.msk.bf16.gmra.mxu0 %vm498_vm0, %v2180_v36  ;;  %v768_v41 = vmax.f32 %v615_v38, 0.0 }
  0xb8   : > { %v616_v39 = vpop.f32.mrf.mxu0 }
  0xb9   : > { %v617_v40 = vadd.f32 %v616_v39, %v2350_v21  ;;  %v2412_v39 = vperm.slane %v2347_v19, 1 }
  0xbb   : > { %v769_v42 = vmax.f32 %v617_v40, 0.0  ;;  %v2187_v40 = vld [vmem:[%s2301_s7 + $0x88] sm:$0xff] }
  0xbd   : > { %v830_v43 = vpack.c.bf16 %v769_v42, %v768_v41 }
  0xbf   : > { %943 = vmatmul.bf16.gmra.mxu1 %v830_v43 }
  0xc0   : > { %v619_v45 = vpop.f32.mrf.mxu0 }
  0xc1   : > { %v620_v46 = vadd.f32 %v619_v45, %v2350_v21 }
  0xc3   : > { %2035 = vmatmul.msk.bf16.gmra.mxu0 %vm498_vm0, %v2181_v44  ;;  %v770_v49 = vmax.f32 %v620_v46, 0.0 }
  0xc8   : > { %v621_v47 = vpop.f32.mrf.mxu0 }
  0xc9   : > { %v622_v48 = vadd.f32 %v621_v47, %v2350_v21 }
  0xcb   : > { %v771_v50 = vmax.f32 %v622_v48, 0.0 }
  0xcd   : > { %v831_v51 = vpack.c.bf16 %v771_v50, %v770_v49 }
  0xcf   : > { %948 = vmatmul.bf16.gmra.mxu1 %v831_v51 }
  0xd0   : > { %v624_v53 = vpop.f32.mrf.mxu0 }
  0xd1   : > { %v625_v54 = vadd.f32 %v624_v53, %v2350_v21 }
  0xd3   : > { %2036 = vmatmul.msk.bf16.gmra.mxu0 %vm498_vm0, %v2182_v52  ;;  %v772_v57 = vmax.f32 %v625_v54, 0.0 }
  0xd8   : > { %v626_v55 = vpop.f32.mrf.mxu0 }
  0xd9   : > { %v627_v56 = vadd.f32 %v626_v55, %v2350_v21  ;;  %v2188_v55 = vld [vmem:[%s2301_s7 + $0x90] sm:$0xff] }
  0xdb   : > { %v773_v58 = vmax.f32 %v627_v56, 0.0 }
  0xdd   : > { %v832_v59 = vpack.c.bf16 %v773_v58, %v772_v57 }
  0xdf   : > { %953 = vmatmul.bf16.gmra.mxu1 %v832_v59 }
  0xe0   : > { %v629_v61 = vpop.f32.mrf.mxu0 }
  0xe1   : > { %v630_v62 = vadd.f32 %v629_v61, %v2350_v21 }
  0xe3   : > { %2037 = vmatmul.msk.bf16.gmra.mxu0 %vm498_vm0, %v2183_v60  ;;  %v774_v2 = vmax.f32 %v630_v62, 0.0 }
  0xe8   : > { %v631_v63 = vpop.f32.mrf.mxu0 }
  0xe9   : > { %v632_v0 = vadd.f32 %v631_v63, %v2350_v21 }
  0xeb   : > { %v775_v3 = vmax.f32 %v632_v0, 0.0 }
  0xed   : > { %v833_v4 = vpack.c.bf16 %v775_v3, %v774_v2 }
  0xef   : > { %958 = vmatmul.bf16.gmra.mxu1 %v833_v4 }
  0xf0   : > { %v634_v7 = vpop.f32.mrf.mxu0 }
  0xf1   : > { %v635_v10 = vadd.f32 %v634_v7, %v2350_v21 }
  0xf3   : > { %2038 = vmatmul.msk.bf16.gmra.mxu0 %vm498_vm0, %v2184_v6  ;;  %v776_v14 = vmax.f32 %v635_v10, 0.0  ;;  %v2189_v6 = vld [vmem:[%s2301_s7 + $0x98] sm:$0xff] }
  0xf8   : > { %v636_v11 = vpop.f32.mrf.mxu0 }
  0xf9   : > { %v637_v12 = vadd.f32 %v636_v11, %v2350_v21 }
  0xfb   : > { %v777_v15 = vmax.f32 %v637_v12, 0.0 }
  0xfd   : > { %v834_v16 = vpack.c.bf16 %v777_v15, %v776_v14 }
  0xff   : > { %963 = vmatmul.bf16.gmra.mxu1 %v834_v16 }
 0x100   : > { %v639_v20 = vpop.f32.mrf.mxu0 }
 0x101   : > { %v640_v24 = vadd.f32 %v639_v20, %v2350_v21 }
 0x103   : > { %2039 = vmatmul.msk.bf16.gmra.mxu0 %vm498_vm0, %v2185_v18  ;;  %v778_v27 = vmax.f32 %v640_v24, 0.0 }
 0x108   : > { %v641_v25 = vpop.f32.mrf.mxu0 }
 0x109   : > { %v642_v26 = vadd.f32 %v641_v25, %v2350_v21 }
 0x10b   : > { %v779_v28 = vmax.f32 %v642_v26, 0.0 }
 0x10d   : > { %v835_v29 = vpack.c.bf16 %v779_v28, %v778_v27 }
 0x10f   : > { %968 = vmatmul.bf16.gmra.mxu1 %v835_v29 }
 0x110   : > { %v644_v31 = vpop.f32.mrf.mxu0 }
 0x111   : > { %v645_v32 = vadd.f32 %v644_v31, %v2350_v21 }
 0x113   : > { %2040 = vmatmul.msk.bf16.gmra.mxu0 %vm498_vm0, %v2186_v30  ;;  %v780_v35 = vmax.f32 %v645_v32, 0.0 }
 0x118   : > { %v646_v33 = vpop.f32.mrf.mxu0 }
 0x119   : > { %v647_v34 = vadd.f32 %v646_v33, %v2350_v21 }
 0x11b   : > { %v781_v36 = vmax.f32 %v647_v34, 0.0 }
 0x11c   : > { %v934_v37 = vpop.f32.mrf.mxu1 }
 0x11d   : > { %v836_v38 = vpack.c.bf16 %v781_v36, %v780_v35  ;;  %v935_v42 = vadd.f32 %v934_v37, %v2412_v39 }
 0x11f   : > { %973 = vmatmul.bf16.gmra.mxu1 %v836_v38  ;;  %v1094_v45 = vmax.f32 %v935_v42, 0.0  ;;  %v2191_v38 = vld [vmem:[%s2301_s7 + $0xa8] sm:$0xff] }
 0x120   : > { %v649_v41 = vpop.f32.mrf.mxu0 }
 0x121   : > { %v650_v46 = vadd.f32 %v649_v41, %v2350_v21 }
 0x123   : > { %2041 = vmatmul.msk.bf16.gmra.mxu0 %vm498_vm0, %v2187_v40  ;;  %v782_v51 = vmax.f32 %v650_v46, 0.0 }
 0x124   : > { %v936_v43 = vpop.f32.mrf.mxu1 }
 0x125   : > { %v937_v44 = vadd.f32 %v936_v43, %v2412_v39 }
 0x127   : > { %v1095_v47 = vmax.f32 %v937_v44, 0.0 }
 0x128   : > { %v651_v48 = vpop.f32.mrf.mxu0 }
 0x129   : > { %v652_v49 = vadd.f32 %v651_v48, %v2350_v21  ;;  %v1158_v50 = vpack.c.bf16 %v1095_v47, %v1094_v45 }
 0x12b   : > { %v783_v52 = vmax.f32 %v652_v49, 0.0  ;;  %1264 = vmatmul.bf16.vlgmr.msra.gmra.mxu2 %v1158_v50 }
 0x12c   : > { %v939_v53 = vpop.f32.mrf.mxu1 }
 0x12d   : > { %v837_v54 = vpack.c.bf16 %v783_v52, %v782_v51  ;;  %v940_v57 = vadd.f32 %v939_v53, %v2412_v39 }
 0x12f   : > { %978 = vmatmul.bf16.gmra.mxu1 %v837_v54  ;;  %v1096_v60 = vmax.f32 %v940_v57, 0.0  ;;  %v2192_v54 = vld [vmem:[%s2301_s7 + $0xb0] sm:$0xff] }
 0x130   : > { %v654_v56 = vpop.f32.mrf.mxu0 }
 0x131   : > { %v655_v61 = vadd.f32 %v654_v56, %v2350_v21 }
 0x133   : > { %2042 = vmatmul.msk.bf16.gmra.mxu0 %vm498_vm0, %v2188_v55  ;;  %v784_v2 = vmax.f32 %v655_v61, 0.0 }
 0x134   : > { %v941_v58 = vpop.f32.mrf.mxu1 }
 0x135   : > { %v942_v59 = vadd.f32 %v941_v58, %v2412_v39 }
 0x137   : > { %v1097_v62 = vmax.f32 %v942_v59, 0.0 }
 0x138   : > { %v656_v63 = vpop.f32.mrf.mxu0 }
 0x139   : > { %v657_v0 = vadd.f32 %v656_v63, %v2350_v21  ;;  %v1159_v1 = vpack.c.bf16 %v1097_v62, %v1096_v60 }
 0x13b   : > { %v785_v3 = vmax.f32 %v657_v0, 0.0  ;;  %1269 = vmatmul.bf16.gmra.mxu2 %v1159_v1 }
 0x13c   : > { %v944_v4 = vpop.f32.mrf.mxu1 }
 0x13d   : > { %v838_v5 = vpack.c.bf16 %v785_v3, %v784_v2  ;;  %v945_v8 = vadd.f32 %v944_v4, %v2412_v39  ;;  %v2227_v4 = vld [vmem:[%s2851_s3 + $0x38] sm:$0xff] }
 0x13e   : > { %1589 = vmatpush.bf16.msra.mxu3 %v2227_v4 }
 0x13f   : > { %983 = vmatmul.bf16.gmra.mxu1 %v838_v5  ;;  %v1098_v11 = vmax.f32 %v945_v8, 0.0  ;;  %v2226_v8 = vld [vmem:[%s2851_s3 + $0x30] sm:$0xff] }
 0x140   : > { %v659_v7 = vpop.f32.mrf.mxu0 }
 0x141   : > { %v660_v12 = vadd.f32 %v659_v7, %v2350_v21 }
 0x142   : > { %1590 = vmatpush.bf16.msra.mxu3 %v2226_v8 }
 0x143   : > { %2043 = vmatmul.msk.bf16.gmra.mxu0 %vm498_vm0, %v2189_v6  ;;  %v786_v17 = vmax.f32 %v660_v12, 0.0  ;;  %v2193_v6 = vld [vmem:[%s2301_s7 + $0xb8] sm:$0xff] }
 0x144   : > { %v946_v9 = vpop.f32.mrf.mxu1 }
 0x145   : > { %v947_v10 = vadd.f32 %v946_v9, %v2412_v39 }
 0x147   : > { %v1099_v13 = vmax.f32 %v947_v10, 0.0 }
 0x148   : > { %v661_v14 = vpop.f32.mrf.mxu0 }
 0x149   : > { %v662_v15 = vadd.f32 %v661_v14, %v2350_v21  ;;  %v1160_v16 = vpack.c.bf16 %v1099_v13, %v1098_v11  ;;  %v2225_v11 = vld [vmem:[%s2851_s3 + $0x28] sm:$0xff] }
 0x14a   : > { %1591 = vmatpush.bf16.msra.mxu3 %v2225_v11 }
 0x14b   : > { %v787_v18 = vmax.f32 %v662_v15, 0.0  ;;  %1274 = vmatmul.bf16.gmra.mxu2 %v1160_v16 }
 0x14c   : > { %v949_v20 = vpop.f32.mrf.mxu1 }
 0x14d   : > { %v839_v22 = vpack.c.bf16 %v787_v18, %v786_v17  ;;  %v950_v25 = vadd.f32 %v949_v20, %v2412_v39  ;;  %v2224_v17 = vld [vmem:[%s2851_s3 + $0x20] sm:$0xff] }
 0x14e   : > { %1592 = vmatpush.bf16.msra.mxu3 %v2224_v17 }
 0x14f   : > { %988 = vmatmul.bf16.gmra.mxu1 %v839_v22  ;;  %v1100_v28 = vmax.f32 %v950_v25, 0.0  ;;  %v2223_v25 = vld [vmem:[%s2851_s3 + $0x18] sm:$0xff] }
 0x150   : > { %v664_v24 = vpop.f32.mrf.mxu0 }
 0x151   : > { %v665_v29 = vadd.f32 %v664_v24, %v2350_v21 }
 0x152   : > { %1593 = vmatpush.bf16.msra.mxu3 %v2223_v25 }
 0x153   : > { %2044 = vmatmul.msk.bf16.gmra.mxu0 %vm498_vm0, %v2190_v23  ;;  %v788_v34 = vmax.f32 %v665_v29, 0.0  ;;  %v2222_v29 = vld [vmem:[%s2851_s3 + $0x10] sm:$0xff] }
 0x154   : > { %v951_v26 = vpop.f32.mrf.mxu1 }
 0x155   : > { %v952_v27 = vadd.f32 %v951_v26, %v2412_v39 }
 0x156   : > { %1594 = vmatpush.bf16.msra.mxu3 %v2222_v29 }
 0x157   : > { %v1101_v30 = vmax.f32 %v952_v27, 0.0  ;;  %v2194_v27 = vld [vmem:[%s2301_s7 + $0xc0] sm:$0xff] }
 0x158   : > { %v666_v31 = vpop.f32.mrf.mxu0 }
 0x159   : > { %v667_v32 = vadd.f32 %v666_v31, %v2350_v21  ;;  %v1161_v33 = vpack.c.bf16 %v1101_v30, %v1100_v28 }
 0x15b   : > { %v789_v35 = vmax.f32 %v667_v32, 0.0  ;;  %1279 = vmatmul.bf16.gmra.mxu2 %v1161_v33  ;;  %v2221_v32 = vld [vmem:[%s2851_s3 + $0x8] sm:$0xff] }
 0x15c   : > { %v954_v36 = vpop.f32.mrf.mxu1  ;;  %1595 = vmatpush.bf16.msra.mxu3 %v2221_v32 }
 0x15d   : > { %v840_v37 = vpack.c.bf16 %v789_v35, %v788_v34  ;;  %v955_v41 = vadd.f32 %v954_v36, %v2412_v39 }
 0x15f   : > { %993 = vmatmul.bf16.gmra.mxu1 %v840_v37  ;;  %v1102_v44 = vmax.f32 %v955_v41, 0.0 }
 0x160   : > { %v669_v40 = vpop.f32.mrf.mxu0 }
 0x161   : > { %v670_v45 = vadd.f32 %v669_v40, %v2350_v21 }
 0x163   : > { %2045 = vmatmul.msk.bf16.gmra.mxu0 %vm498_vm0, %v2191_v38  ;;  %v790_v50 = vmax.f32 %v670_v45, 0.0  ;;  %v2220_v38 = vld [vmem:[%s2851_s3] sm:$0xff] }
 0x164   : > { %v956_v42 = vpop.f32.mrf.mxu1  ;;  %1596 = vmatpush.bf16.msra.mxu3 %v2220_v38 }
 0x165   : > { %v957_v43 = vadd.f32 %v956_v42, %v2412_v39 }
 0x167   : > { %v1103_v46 = vmax.f32 %v957_v43, 0.0 }
 0x168   : > { %v671_v47 = vpop.f32.mrf.mxu0 }
 0x169   : > { %v672_v48 = vadd.f32 %v671_v47, %v2350_v21  ;;  %v1162_v49 = vpack.c.bf16 %v1103_v46, %v1102_v44  ;;  %v2195_v46 = vld [vmem:[%s2301_s7 + $0xc8] sm:$0xff] }
 0x16b   : > { %v791_v51 = vmax.f32 %v672_v48, 0.0  ;;  %1284 = vmatmul.bf16.gmra.mxu2 %v1162_v49 }
 0x16c   : > { %v959_v52 = vpop.f32.mrf.mxu1 }
 0x16d   : > { %v841_v53 = vpack.c.bf16 %v791_v51, %v790_v50  ;;  %v960_v56 = vadd.f32 %v959_v52, %v2412_v39 }
 0x16f   : > { %998 = vmatmul.bf16.gmra.mxu1 %v841_v53  ;;  %v1104_v59 = vmax.f32 %v960_v56, 0.0 }
 0x170   : > { %v674_v55 = vpop.f32.mrf.mxu0 }
 0x171   : > { %v675_v60 = vadd.f32 %v674_v55, %v2350_v21 }
 0x173   : > { %2046 = vmatmul.msk.bf16.gmra.mxu0 %vm498_vm0, %v2192_v54  ;;  %v792_v1 = vmax.f32 %v675_v60, 0.0 }
 0x174   : > { %v961_v57 = vpop.f32.mrf.mxu1 }
 0x175   : > { %v962_v58 = vadd.f32 %v961_v57, %v2412_v39 }
 0x177   : > { %v1105_v61 = vmax.f32 %v962_v58, 0.0 }
 0x178   : > { %v676_v62 = vpop.f32.mrf.mxu0 }
 0x179   : > { %v677_v63 = vadd.f32 %v676_v62, %v2350_v21  ;;  %v1163_v0 = vpack.c.bf16 %v1105_v61, %v1104_v59  ;;  %v2196_v62 = vld [vmem:[%s2301_s7 + $0xd0] sm:$0xff] }
 0x17b   : > { %v793_v2 = vmax.f32 %v677_v63, 0.0  ;;  %1289 = vmatmul.bf16.gmra.mxu2 %v1163_v0  ;;  %v2494_v0 = vperm.slane %v2347_v19, 2 }
 0x17c   : > { %v964_v3 = vpop.f32.mrf.mxu1 }
 0x17d   : > { %v842_v5 = vpack.c.bf16 %v793_v2, %v792_v1  ;;  %v965_v9 = vadd.f32 %v964_v3, %v2412_v39 }
 0x17f   : > { %1003 = vmatmul.bf16.gmra.mxu1 %v842_v5  ;;  %v1106_v13 = vmax.f32 %v965_v9, 0.0 }
 0x180   : > { %v679_v7 = vpop.f32.mrf.mxu0 }
 0x181   : > { %v680_v14 = vadd.f32 %v679_v7, %v2350_v21 }
 0x183   : > { %2047 = vmatmul.msk.bf16.gmra.mxu0 %vm498_vm0, %v2193_v6  ;;  %v794_v22 = vmax.f32 %v680_v14, 0.0 }
 0x184   : > { %v966_v10 = vpop.f32.mrf.mxu1 }
 0x185   : > { %v967_v12 = vadd.f32 %v966_v10, %v2412_v39 }
 0x187   : > { %v1107_v15 = vmax.f32 %v967_v12, 0.0 }
 0x188   : > { %v681_v16 = vpop.f32.mrf.mxu0 }
 0x189   : > { %v682_v18 = vadd.f32 %v681_v16, %v2350_v21  ;;  %v1164_v20 = vpack.c.bf16 %v1107_v15, %v1106_v13 }
 0x18b   : > { %v795_v23 = vmax.f32 %v682_v18, 0.0  ;;  %1294 = vmatmul.bf16.gmra.mxu2 %v1164_v20 }
 0x18c   : > { %v969_v24 = vpop.f32.mrf.mxu1 }
 0x18d   : > { %v843_v26 = vpack.c.bf16 %v795_v23, %v794_v22  ;;  %v970_v30 = vadd.f32 %v969_v24, %v2412_v39  ;;  %v2197_v22 = vld [vmem:[%s2301_s7 + $0xd8] sm:$0xff] }
 0x18f   : > { %1008 = vmatmul.bf16.gmra.mxu1 %v843_v26  ;;  %v1108_v34 = vmax.f32 %v970_v30, 0.0 }
 0x190   : > { %v684_v28 = vpop.f32.mrf.mxu0 }
 0x191   : > { %v685_v35 = vadd.f32 %v684_v28, %v2350_v21 }
 0x193   : > { %2048 = vmatmul.msk.bf16.gmra.mxu0 %vm498_vm0, %v2194_v27  ;;  %v796_v42 = vmax.f32 %v685_v35, 0.0 }
 0x194   : > { %v971_v31 = vpop.f32.mrf.mxu1 }
 0x195   : > { %v972_v33 = vadd.f32 %v971_v31, %v2412_v39 }
 0x197   : > { %v1109_v36 = vmax.f32 %v972_v33, 0.0 }
 0x198   : > { %v686_v37 = vpop.f32.mrf.mxu0 }
 0x199   : > { %v687_v40 = vadd.f32 %v686_v37, %v2350_v21  ;;  %v1165_v41 = vpack.c.bf16 %v1109_v36, %v1108_v34 }
 0x19b   : > { %v797_v43 = vmax.f32 %v687_v40, 0.0  ;;  %1299 = vmatmul.bf16.gmra.mxu2 %v1165_v41 }
 0x19c   : > { %v974_v44 = vpop.f32.mrf.mxu1 }
 0x19d   : > { %v844_v45 = vpack.c.bf16 %v797_v43, %v796_v42  ;;  %v975_v48 = vadd.f32 %v974_v44, %v2412_v39 }
 0x19f   : > { %1013 = vmatmul.bf16.gmra.mxu1 %v844_v45  ;;  %v1110_v51 = vmax.f32 %v975_v48, 0.0  ;;  %v2198_v45 = vld [vmem:[%s2301_s7 + $0xe0] sm:$0xff] }
 0x1a0   : > { %v689_v47 = vpop.f32.mrf.mxu0 }
 0x1a1   : > { %v690_v52 = vadd.f32 %v689_v47, %v2350_v21 }
 0x1a3   : > { %2049 = vmatmul.msk.bf16.gmra.mxu0 %vm498_vm0, %v2195_v46  ;;  %v798_v57 = vmax.f32 %v690_v52, 0.0 }
 0x1a4   : > { %v976_v49 = vpop.f32.mrf.mxu1 }
 0x1a5   : > { %v977_v50 = vadd.f32 %v976_v49, %v2412_v39 }
 0x1a7   : > { %v1111_v53 = vmax.f32 %v977_v50, 0.0 }
 0x1a8   : > { %v691_v54 = vpop.f32.mrf.mxu0 }
 0x1a9   : > { %v692_v55 = vadd.f32 %v691_v54, %v2350_v21  ;;  %v1166_v56 = vpack.c.bf16 %v1111_v53, %v1110_v51 }
 0x1ab   : > { %v799_v58 = vmax.f32 %v692_v55, 0.0  ;;  %1304 = vmatmul.bf16.gmra.mxu2 %v1166_v56 }
 0x1ac   : > { %v979_v59 = vpop.f32.mrf.mxu1 }
 0x1ad   : > { %v845_v60 = vpack.c.bf16 %v799_v58, %v798_v57  ;;  %v980_v1 = vadd.f32 %v979_v59, %v2412_v39 }
 0x1ae   : > { %v1265_v61 = vpop.f32.mrf.mxu2 }
 0x1af   : > { %1018 = vmatmul.bf16.gmra.mxu1 %v845_v60  ;;  %v1266_v3 = vadd.f32 %v1265_v61, %v2494_v0  ;;  %v1112_v6 = vmax.f32 %v980_v1, 0.0 }
 0x1b0   : > { %v694_v63 = vpop.f32.mrf.mxu0 }
 0x1b1   : > { %v695_v7 = vadd.f32 %v694_v63, %v2350_v21  ;;  %v1425_v19 = vmax.f32 %v1266_v3, 0.0 }
 0x1b3   : > { %2050 = vmatmul.msk.bf16.gmra.mxu0 %vm498_vm0, %v2196_v62  ;;  %v800_v14 = vmax.f32 %v695_v7, 0.0 }
 0x1b4   : > { %v981_v2 = vpop.f32.mrf.mxu1 }
 0x1b5   : > { %v982_v4 = vadd.f32 %v981_v2, %v2412_v39 }
 0x1b6   : > { %v1267_v5 = vpop.f32.mrf.mxu2 }
 0x1b7   : > { %v1113_v8 = vmax.f32 %v982_v4, 0.0  ;;  %v1268_v9 = vadd.f32 %v1267_v5, %v2494_v0  ;;  %v2199_v4 = vld [vmem:[%s2301_s7 + $0xe8] sm:$0xff] }
 0x1b8   : > { %v696_v10 = vpop.f32.mrf.mxu0 }
 0x1b9   : > { %v1426_v11 = vmax.f32 %v1268_v9, 0.0  ;;  %v697_v12 = vadd.f32 %v696_v10, %v2350_v21  ;;  %v1167_v13 = vpack.c.bf16 %v1113_v8, %v1112_v6 }
 0x1bb   : > { %v801_v15 = vmax.f32 %v697_v12, 0.0  ;;  %1309 = vmatmul.bf16.gmra.mxu2 %v1167_v13  ;;  %v1489_v16 = vpack.c.bf16 %v1426_v11, %v1425_v19 }
 0x1bc   : > { %v984_v17 = vpop.f32.mrf.mxu1 }
 0x1bd   : > { %1597 = vmatmul.bf16.vlgmr.msra.gmra.mxu3 %v1489_v16  ;;  %v846_v18 = vpack.c.bf16 %v801_v15, %v800_v14  ;;  %v985_v24 = vadd.f32 %v984_v17, %v2412_v39 }
 0x1be   : > { %v1270_v20 = vpop.f32.mrf.mxu2 }
 0x1bf   : > { %1023 = vmatmul.bf16.gmra.mxu1 %v846_v18  ;;  %v1271_v26 = vadd.f32 %v1270_v20, %v2494_v0  ;;  %v1114_v29 = vmax.f32 %v985_v24, 0.0 }
 0x1c0   : > { %v699_v23 = vpop.f32.mrf.mxu0 }
 0x1c1   : > { %v700_v30 = vadd.f32 %v699_v23, %v2350_v21  ;;  %v1427_v34 = vmax.f32 %v1271_v26, 0.0 }
 0x1c3   : > { %2051 = vmatmul.msk.bf16.gmra.mxu0 %vm498_vm0, %v2197_v22  ;;  %v802_v38 = vmax.f32 %v700_v30, 0.0 }
 0x1c4   : > { %v986_v25 = vpop.f32.mrf.mxu1 }
 0x1c5   : > { %v987_v27 = vadd.f32 %v986_v25, %v2412_v39 }
 0x1c6   : > { %v1272_v28 = vpop.f32.mrf.mxu2 }
 0x1c7   : > { %v1115_v31 = vmax.f32 %v987_v27, 0.0  ;;  %v1273_v32 = vadd.f32 %v1272_v28, %v2494_v0  ;;  %v2200_v27 = vld [vmem:[%s2301_s7 + $0xf0] sm:$0xff] }
 0x1c8   : > { %v701_v33 = vpop.f32.mrf.mxu0 }
 0x1c9   : > { %v1428_v35 = vmax.f32 %v1273_v32, 0.0  ;;  %v702_v36 = vadd.f32 %v701_v33, %v2350_v21  ;;  %v1168_v37 = vpack.c.bf16 %v1115_v31, %v1114_v29 }
 0x1cb   : > { %v803_v40 = vmax.f32 %v702_v36, 0.0  ;;  %1314 = vmatmul.bf16.gmra.mxu2 %v1168_v37  ;;  %v1490_v41 = vpack.c.bf16 %v1428_v35, %v1427_v34 }
 0x1cc   : > { %v989_v42 = vpop.f32.mrf.mxu1 }
 0x1cd   : > { %1602 = vmatmul.bf16.gmra.mxu3 %v1490_v41  ;;  %v847_v43 = vpack.c.bf16 %v803_v40, %v802_v38  ;;  %v990_v47 = vadd.f32 %v989_v42, %v2412_v39 }
 0x1ce   : > { %v1275_v44 = vpop.f32.mrf.mxu2 }
 0x1cf   : > { %1028 = vmatmul.bf16.gmra.mxu1 %v847_v43  ;;  %v1276_v49 = vadd.f32 %v1275_v44, %v2494_v0  ;;  %v1116_v52 = vmax.f32 %v990_v47, 0.0 }
 0x1d0   : > { %v704_v46 = vpop.f32.mrf.mxu0 }
 0x1d1   : > { %v705_v53 = vadd.f32 %v704_v46, %v2350_v21  ;;  %v1429_v57 = vmax.f32 %v1276_v49, 0.0 }
 0x1d3   : > { %2052 = vmatmul.msk.bf16.gmra.mxu0 %vm498_vm0, %v2198_v45  ;;  %v804_v61 = vmax.f32 %v705_v53, 0.0 }
 0x1d4   : > { %v991_v48 = vpop.f32.mrf.mxu1 }
 0x1d5   : > { %v992_v50 = vadd.f32 %v991_v48, %v2412_v39 }
 0x1d6   : > { %v1277_v51 = vpop.f32.mrf.mxu2 }
 0x1d7   : > { %v1117_v54 = vmax.f32 %v992_v50, 0.0  ;;  %v1278_v55 = vadd.f32 %v1277_v51, %v2494_v0  ;;  %v2201_v50 = vld [vmem:[%s2301_s7 + $0xf8] sm:$0xff]  ;;  %s1887_s7 = sshll.u32 %s2856_s25, 3 }
 0x1d8   : > { %v706_v56 = vpop.f32.mrf.mxu0  ;;  %s2570_s20 = scalar_lea.vmem %s2854_s6, %s1887_s7 }
 0x1d9   : > { %v1430_v58 = vmax.f32 %v1278_v55, 0.0  ;;  %v707_v59 = vadd.f32 %v706_v56, %v2350_v21  ;;  %v1169_v60 = vpack.c.bf16 %v1117_v54, %v1116_v52 }
 0x1db   : > { %v805_v62 = vmax.f32 %v707_v59, 0.0  ;;  %1319 = vmatmul.bf16.gmra.mxu2 %v1169_v60  ;;  %v1491_v63 = vpack.c.bf16 %v1430_v58, %v1429_v57 }
 0x1dc   : > { %v994_v1 = vpop.f32.mrf.mxu1 }
 0x1dd   : > { %v848_v2 = vpack.c.bf16 %v805_v62, %v804_v61  ;;  %1607 = vmatmul.bf16.gmra.mxu3 %v1491_v63  ;;  %v995_v6 = vadd.f32 %v994_v1, %v2412_v39 }
 0x1de   : > { %v1280_v3 = vpop.f32.mrf.mxu2 }
 0x1df   : > { %1033 = vmatmul.bf16.gmra.mxu1 %v848_v2  ;;  %v1281_v8 = vadd.f32 %v1280_v3, %v2494_v0  ;;  %v1118_v19 = vmax.f32 %v995_v6, 0.0 }
 0x1e0   : > { %v709_v5 = vpop.f32.mrf.mxu0 }
 0x1e1   : > { %v710_v11 = vadd.f32 %v709_v5, %v2350_v21  ;;  %v1431_v15 = vmax.f32 %v1281_v8, 0.0 }
 0x1e3   : > { %2053 = vmatmul.msk.bf16.gmra.mxu0 %vm498_vm0, %v2199_v4  ;;  %v806_v20 = vmax.f32 %v710_v11, 0.0 }
 0x1e4   : > { %v996_v7 = vpop.f32.mrf.mxu1 }
 0x1e5   : > { %v997_v9 = vadd.f32 %v996_v7, %v2412_v39 }
 0x1e6   : > { %v1282_v10 = vpop.f32.mrf.mxu2 }
 0x1e7   : > { %v1119_v12 = vmax.f32 %v997_v9, 0.0  ;;  %v1283_v13 = vadd.f32 %v1282_v10, %v2494_v0 }
 0x1e8   : > { %v711_v14 = vpop.f32.mrf.mxu0 }
 0x1e9   : > { %v1432_v16 = vmax.f32 %v1283_v13, 0.0  ;;  %v712_v17 = vadd.f32 %v711_v14, %v2350_v21  ;;  %v1170_v18 = vpack.c.bf16 %v1119_v12, %v1118_v19 }
 0x1eb   : > { %v807_v22 = vmax.f32 %v712_v17, 0.0  ;;  %1324 = vmatmul.bf16.gmra.mxu2 %v1170_v18  ;;  %v1492_v23 = vpack.c.bf16 %v1432_v16, %v1431_v15 }
 0x1ec   : > { %v999_v24 = vpop.f32.mrf.mxu1 }
 0x1ed   : > { %v849_v25 = vpack.c.bf16 %v807_v22, %v806_v20  ;;  %1612 = vmatmul.bf16.gmra.mxu3 %v1492_v23  ;;  %v1000_v29 = vadd.f32 %v999_v24, %v2412_v39 }
 0x1ee   : > { %v1285_v26 = vpop.f32.mrf.mxu2 }
 0x1ef   : > { %1038 = vmatmul.bf16.gmra.mxu1 %v849_v25  ;;  %v1286_v31 = vadd.f32 %v1285_v26, %v2494_v0  ;;  %v1120_v34 = vmax.f32 %v1000_v29, 0.0 }
 0x1f0   : > { %v714_v28 = vpop.f32.mrf.mxu0 }
 0x1f1   : > { %v715_v35 = vadd.f32 %v714_v28, %v2350_v21  ;;  %v1433_v40 = vmax.f32 %v1286_v31, 0.0 }
 0x1f3   : > { %2054 = vmatmul.msk.bf16.gmra.mxu0 %vm498_vm0, %v2200_v27  ;;  %v808_v44 = vmax.f32 %v715_v35, 0.0 }
 0x1f4   : > { %v1001_v30 = vpop.f32.mrf.mxu1 }
 0x1f5   : > { %v1002_v32 = vadd.f32 %v1001_v30, %v2412_v39 }
 0x1f6   : > { %v1287_v33 = vpop.f32.mrf.mxu2 }
 0x1f7   : > { %v1121_v36 = vmax.f32 %v1002_v32, 0.0  ;;  %v1288_v37 = vadd.f32 %v1287_v33, %v2494_v0 }
 0x1f8   : > { %v716_v38 = vpop.f32.mrf.mxu0 }
 0x1f9   : > { %v1434_v41 = vmax.f32 %v1288_v37, 0.0  ;;  %v717_v42 = vadd.f32 %v716_v38, %v2350_v21  ;;  %v1171_v43 = vpack.c.bf16 %v1121_v36, %v1120_v34 }
 0x1fb   : > { %v809_v45 = vmax.f32 %v717_v42, 0.0  ;;  %1329 = vmatmul.bf16.gmra.mxu2 %v1171_v43  ;;  %v1493_v46 = vpack.c.bf16 %v1434_v41, %v1433_v40 }
 0x1fc   : > { %v1004_v47 = vpop.f32.mrf.mxu1 }
 0x1fd   : > { %v850_v48 = vpack.c.bf16 %v809_v45, %v808_v44  ;;  %1617 = vmatmul.bf16.gmra.mxu3 %v1493_v46  ;;  %v1005_v52 = vadd.f32 %v1004_v47, %v2412_v39 }
 0x1fe   : > { %v1290_v49 = vpop.f32.mrf.mxu2 }
 0x1ff   : > { %1043 = vmatmul.bf16.gmra.mxu1 %v850_v48  ;;  %v1291_v54 = vadd.f32 %v1290_v49, %v2494_v0  ;;  %v1122_v57 = vmax.f32 %v1005_v52, 0.0 }
 0x200   : > { %v719_v51 = vpop.f32.mrf.mxu0 }
 0x201   : > { %v720_v58 = vadd.f32 %v719_v51, %v2350_v21  ;;  %v1435_v62 = vmax.f32 %v1291_v54, 0.0 }
 0x203   : > { %2055 = vmatmul.msk.bf16.gmra.mxu0 %vm498_vm0, %v2201_v50  ;;  %v810_v3 = vmax.f32 %v720_v58, 0.0 }
 0x204   : > { %v1006_v53 = vpop.f32.mrf.mxu1 }
 0x205   : > { %v1007_v55 = vadd.f32 %v1006_v53, %v2412_v39 }
 0x206   : > { %v1292_v56 = vpop.f32.mrf.mxu2 }
 0x207   : > { %v1123_v59 = vmax.f32 %v1007_v55, 0.0  ;;  %v1293_v60 = vadd.f32 %v1292_v56, %v2494_v0 }
 0x208   : > { %v721_v61 = vpop.f32.mrf.mxu0 }
 0x209   : > { %v1436_v63 = vmax.f32 %v1293_v60, 0.0  ;;  %v722_v1 = vadd.f32 %v721_v61, %v2350_v21  ;;  %v1172_v2 = vpack.c.bf16 %v1123_v59, %v1122_v57 }
 0x20b   : > { %v811_v4 = vmax.f32 %v722_v1, 0.0  ;;  %1334 = vmatmul.bf16.gmra.mxu2 %v1172_v2  ;;  %v1494_v5 = vpack.c.bf16 %v1436_v63, %v1435_v62 }
 0x20c   : > { %v1009_v6 = vpop.f32.mrf.mxu1 }
 0x20d   : > { %v851_v7 = vpack.c.bf16 %v811_v4, %v810_v3  ;;  %1622 = vmatmul.bf16.gmra.mxu3 %v1494_v5  ;;  %v1010_v10 = vadd.f32 %v1009_v6, %v2412_v39 }
 0x20e   : > { %v1295_v8 = vpop.f32.mrf.mxu2 }
 0x20f   : > { %1048 = vmatmul.bf16.gmra.mxu1 %v851_v7  ;;  %v1296_v11 = vadd.f32 %v1295_v8, %v2494_v0  ;;  %v1124_v14 = vmax.f32 %v1010_v10, 0.0  ;;  %v2565_v10 = vld [vmem:[%s2853_s5] ss:$0 sm:$0xff] }
 0x210   : > { %v724_v9 = vpop.f32.mrf.mxu0 }
 0x211   : > { %v725_v15 = vadd.f32 %v724_v9, %v2350_v21  ;;  %v1437_v20 = vmax.f32 %v1296_v11, 0.0 }
 0x213   : > { %v812_v25 = vmax.f32 %v725_v15, 0.0 }
 0x214   : > { %v1011_v19 = vpop.f32.mrf.mxu1 }
 0x215   : > { %v1012_v12 = vadd.f32 %v1011_v19, %v2412_v39 }
 0x216   : > { %v1297_v13 = vpop.f32.mrf.mxu2 }
 0x217   : > { %v1125_v16 = vmax.f32 %v1012_v12, 0.0  ;;  %v1298_v17 = vadd.f32 %v1297_v13, %v2494_v0 }
 0x218   : > { %v726_v18 = vpop.f32.mrf.mxu0 }
 0x219   : > { %v1438_v22 = vmax.f32 %v1298_v17, 0.0  ;;  %v727_v23 = vadd.f32 %v726_v18, %v2350_v21  ;;  %v1173_v24 = vpack.c.bf16 %v1125_v16, %v1124_v14 }
 0x21b   : > { %v813_v26 = vmax.f32 %v727_v23, 0.0  ;;  %1339 = vmatmul.bf16.gmra.mxu2 %v1173_v24  ;;  %v1495_v27 = vpack.c.bf16 %v1438_v22, %v1437_v20 }
 0x21c   : > { %v1014_v28 = vpop.f32.mrf.mxu1 }
 0x21d   : > { %v852_v29 = vpack.c.bf16 %v813_v26, %v812_v25  ;;  %1627 = vmatmul.bf16.gmra.mxu3 %v1495_v27  ;;  %v1015_v32 = vadd.f32 %v1014_v28, %v2412_v39 }
 0x21e   : > { %v1300_v30 = vpop.f32.mrf.mxu2 }
 0x21f   : > { %1053 = vmatmul.bf16.gmra.mxu1 %v852_v29  ;;  %v1301_v34 = vadd.f32 %v1300_v30, %v2494_v0  ;;  %v1126_v37 = vmax.f32 %v1015_v32, 0.0 }
 0x220   : > { %v729_v31 = vpop.f32.mrf.mxu0 }
 0x221   : > { %v730_v38 = vadd.f32 %v729_v31, %v2350_v21  ;;  %v1439_v43 = vmax.f32 %v1301_v34, 0.0 }
 0x223   : > { %v814_v47 = vmax.f32 %v730_v38, 0.0 }
 0x224   : > { %v1016_v33 = vpop.f32.mrf.mxu1 }
 0x225   : > { %v1017_v35 = vadd.f32 %v1016_v33, %v2412_v39 }
 0x226   : > { %v1302_v36 = vpop.f32.mrf.mxu2 }
 0x227   : > { %v1127_v40 = vmax.f32 %v1017_v35, 0.0  ;;  %v1303_v41 = vadd.f32 %v1302_v36, %v2494_v0 }
 0x228   : > { %v731_v42 = vpop.f32.mrf.mxu0 }
 0x229   : > { %v1440_v44 = vmax.f32 %v1303_v41, 0.0  ;;  %v732_v45 = vadd.f32 %v731_v42, %v2350_v21  ;;  %v1174_v46 = vpack.c.bf16 %v1127_v40, %v1126_v37 }
 0x22b   : > { %v815_v48 = vmax.f32 %v732_v45, 0.0  ;;  %1344 = vmatmul.bf16.gmra.mxu2 %v1174_v46  ;;  %v1496_v49 = vpack.c.bf16 %v1440_v44, %v1439_v43 }
 0x22c   : > { %v1019_v50 = vpop.f32.mrf.mxu1 }
 0x22d   : > { %v853_v51 = vpack.c.bf16 %v815_v48, %v814_v47  ;;  %1632 = vmatmul.bf16.gmra.mxu3 %v1496_v49  ;;  %v1020_v54 = vadd.f32 %v1019_v50, %v2412_v39 }
 0x22e   : > { %v1305_v52 = vpop.f32.mrf.mxu2 }
 0x22f   : > { %1058 = vmatmul.bf16.gmra.mxu1 %v853_v51  ;;  %v1306_v56 = vadd.f32 %v1305_v52, %v2494_v0  ;;  %v1128_v59 = vmax.f32 %v1020_v54, 0.0 }
 0x230   : > { %v734_v53 = vpop.f32.mrf.mxu0 }
 0x231   : > { %v735_v60 = vadd.f32 %v734_v53, %v2350_v21  ;;  %v1441_v1 = vmax.f32 %v1306_v56, 0.0 }
 0x233   : > { %v816_v5 = vmax.f32 %v735_v60, 0.0 }
 0x234   : > { %v1021_v55 = vpop.f32.mrf.mxu1 }
 0x235   : > { %v1022_v57 = vadd.f32 %v1021_v55, %v2412_v39 }
 0x236   : > { %v1307_v58 = vpop.f32.mrf.mxu2 }
 0x237   : > { %v1129_v61 = vmax.f32 %v1022_v57, 0.0  ;;  %v1308_v62 = vadd.f32 %v1307_v58, %v2494_v0 }
 0x238   : > { %v736_v63 = vpop.f32.mrf.mxu0 }
 0x239   : > { %v1442_v2 = vmax.f32 %v1308_v62, 0.0  ;;  %v737_v3 = vadd.f32 %v736_v63, %v2350_v21  ;;  %v1175_v4 = vpack.c.bf16 %v1129_v61, %v1128_v59 }
 0x23b   : > { %v817_v6 = vmax.f32 %v737_v3, 0.0  ;;  %1349 = vmatmul.bf16.gmra.mxu2 %v1175_v4  ;;  %v1497_v7 = vpack.c.bf16 %v1442_v2, %v1441_v1 }
 0x23c   : > { %v1024_v8 = vpop.f32.mrf.mxu1 }
 0x23d   : > { %v854_v9 = vpack.c.bf16 %v817_v6, %v816_v5  ;;  %1637 = vmatmul.bf16.gmra.mxu3 %v1497_v7  ;;  %v1025_v14 = vadd.f32 %v1024_v8, %v2412_v39 }
 0x23e   : > { %v1310_v19 = vpop.f32.mrf.mxu2 }
 0x23f   : > { %1063 = vmatmul.bf16.gmra.mxu1 %v854_v9  ;;  %v1311_v15 = vadd.f32 %v1310_v19, %v2494_v0  ;;  %v1130_v20 = vmax.f32 %v1025_v14, 0.0 }
 0x240   : > { %v739_v11 = vpop.f32.mrf.mxu0  ;;  %v1598_v12 = vpop.f32.mrf.mxu3 }
 0x241   : > { %v1599_v13 = vadd.f32 %v2565_v10, %v1598_v12  ;;  %v740_v22 = vadd.f32 %v739_v11, %v2350_v21  ;;  %v1443_v25 = vmax.f32 %v1311_v15, 0.0 }
 0x243   : > { %1759 = vst.msk [vmem:[%s2570_s20] sm:$0xff] %vm1758_vm1, %v1599_v13  ;;  %v818_v32 = vmax.f32 %v740_v22, 0.0 }
 0x244   : > { %v1026_v16 = vpop.f32.mrf.mxu1 }
 0x245   : > { %v1027_v17 = vadd.f32 %v1026_v16, %v2412_v39 }
 0x246   : > { %v1312_v18 = vpop.f32.mrf.mxu2 }
 0x247   : > { %v1131_v23 = vmax.f32 %v1027_v17, 0.0  ;;  %v1313_v24 = vadd.f32 %v1312_v18, %v2494_v0 }
 0x248   : > { %v741_v26 = vpop.f32.mrf.mxu0  ;;  %v1600_v27 = vpop.f32.mrf.mxu3 }
 0x249   : > { %v1444_v28 = vmax.f32 %v1313_v24, 0.0  ;;  %v742_v29 = vadd.f32 %v741_v26, %v2350_v21  ;;  %v1601_v30 = vadd.f32 %v2565_v10, %v1600_v27  ;;  %v1176_v31 = vpack.c.bf16 %v1131_v23, %v1130_v20 }
 0x24b   : > { %v819_v33 = vmax.f32 %v742_v29, 0.0  ;;  %1760 = vst.msk [vmem:[%s2570_s20 + $0x8] sm:$0xff] %vm1758_vm1, %v1601_v30  ;;  %1354 = vmatmul.bf16.gmra.mxu2 %v1176_v31  ;;  %v1498_v34 = vpack.c.bf16 %v1444_v28, %v1443_v25 }
 0x24c   : > { %v1029_v35 = vpop.f32.mrf.mxu1 }
 0x24d   : > { %v855_v36 = vpack.c.bf16 %v819_v33, %v818_v32  ;;  %1642 = vmatmul.bf16.gmra.mxu3 %v1498_v34  ;;  %v1030_v42 = vadd.f32 %v1029_v35, %v2412_v39 }
 0x24e   : > { %v1315_v37 = vpop.f32.mrf.mxu2 }
 0x24f   : > { %1068 = vmatmul.bf16.gmra.mxu1 %v855_v36  ;;  %v1316_v43 = vadd.f32 %v1315_v37, %v2494_v0  ;;  %v1132_v47 = vmax.f32 %v1030_v42, 0.0 }
 0x250   : > { %v744_v38 = vpop.f32.mrf.mxu0  ;;  %v1603_v40 = vpop.f32.mrf.mxu3 }
 0x251   : > { %v1604_v41 = vadd.f32 %v2565_v10, %v1603_v40  ;;  %v745_v48 = vadd.f32 %v744_v38, %v2350_v21  ;;  %v1445_v51 = vmax.f32 %v1316_v43, 0.0 }
 0x253   : > { %1761 = vst.msk [vmem:[%s2570_s20 + $0x10] sm:$0xff] %vm1758_vm1, %v1604_v41  ;;  %v820_v58 = vmax.f32 %v745_v48, 0.0 }
 0x254   : > { %v1031_v44 = vpop.f32.mrf.mxu1 }
 0x255   : > { %v1032_v45 = vadd.f32 %v1031_v44, %v2412_v39 }
 0x256   : > { %v1317_v46 = vpop.f32.mrf.mxu2 }
 0x257   : > { %v1133_v49 = vmax.f32 %v1032_v45, 0.0  ;;  %v1318_v50 = vadd.f32 %v1317_v46, %v2494_v0 }
 0x258   : > { %v746_v52 = vpop.f32.mrf.mxu0  ;;  %v1605_v53 = vpop.f32.mrf.mxu3 }
 0x259   : > { %v1446_v54 = vmax.f32 %v1318_v50, 0.0  ;;  %v747_v55 = vadd.f32 %v746_v52, %v2350_v21  ;;  %v1606_v56 = vadd.f32 %v2565_v10, %v1605_v53  ;;  %v1177_v57 = vpack.c.bf16 %v1133_v49, %v1132_v47 }
 0x25b   : > { %v821_v59 = vmax.f32 %v747_v55, 0.0  ;;  %1762 = vst.msk [vmem:[%s2570_s20 + $0x18] sm:$0xff] %vm1758_vm1, %v1606_v56  ;;  %1359 = vmatmul.bf16.gmra.mxu2 %v1177_v57  ;;  %v1499_v60 = vpack.c.bf16 %v1446_v54, %v1445_v51 }
 0x25c   : > { %v1034_v61 = vpop.f32.mrf.mxu1 }
 0x25d   : > { %v856_v62 = vpack.c.bf16 %v821_v59, %v820_v58  ;;  %1647 = vmatmul.bf16.gmra.mxu3 %v1499_v60  ;;  %v1035_v4 = vadd.f32 %v1034_v61, %v2412_v39 }
 0x25e   : > { %v1320_v63 = vpop.f32.mrf.mxu2 }
 0x25f   : > { %1073 = vmatmul.bf16.gmra.mxu1 %v856_v62  ;;  %v1321_v5 = vadd.f32 %v1320_v63, %v2494_v0  ;;  %v1134_v9 = vmax.f32 %v1035_v4, 0.0 }
 0x260   : > { %v749_v1 = vpop.f32.mrf.mxu0  ;;  %v1608_v2 = vpop.f32.mrf.mxu3 }
 0x261   : > { %v1609_v3 = vadd.f32 %v2565_v10, %v1608_v2  ;;  %v750_v19 = vadd.f32 %v749_v1, %v2350_v21  ;;  %v1447_v13 = vmax.f32 %v1321_v5, 0.0 }
 0x263   : > { %1763 = vst.msk [vmem:[%s2570_s20 + $0x20] sm:$0xff] %vm1758_vm1, %v1609_v3  ;;  %v822_v22 = vmax.f32 %v750_v19, 0.0 }
 0x264   : > { %v1036_v6 = vpop.f32.mrf.mxu1 }
 0x265   : > { %v1037_v7 = vadd.f32 %v1036_v6, %v2412_v39 }
 0x266   : > { %v1322_v8 = vpop.f32.mrf.mxu2 }
 0x267   : > { %v1135_v11 = vmax.f32 %v1037_v7, 0.0  ;;  %v1323_v12 = vadd.f32 %v1322_v8, %v2494_v0 }
 0x268   : > { %v751_v14 = vpop.f32.mrf.mxu0  ;;  %v1610_v15 = vpop.f32.mrf.mxu3 }
 0x269   : > { %v1178_v16 = vpack.c.bf16 %v1135_v11, %v1134_v9  ;;  %v1448_v17 = vmax.f32 %v1323_v12, 0.0  ;;  %v752_v18 = vadd.f32 %v751_v14, %v2350_v21  ;;  %v1611_v20 = vadd.f32 %v2565_v10, %v1610_v15 }
 0x26b   : > { %v823_v23 = vmax.f32 %v752_v18, 0.0  ;;  %1764 = vst.msk [vmem:[%s2570_s20 + $0x28] sm:$0xff] %vm1758_vm1, %v1611_v20  ;;  %1364 = vmatmul.bf16.gmra.mxu2 %v1178_v16  ;;  %v1500_v24 = vpack.c.bf16 %v1448_v17, %v1447_v13 }
 0x26c   : > { %v1039_v25 = vpop.f32.mrf.mxu1 }
 0x26d   : > { %v857_v26 = vpack.c.bf16 %v823_v23, %v822_v22  ;;  %1652 = vmatmul.bf16.gmra.mxu3 %v1500_v24  ;;  %v1040_v31 = vadd.f32 %v1039_v25, %v2412_v39 }
 0x26e   : > { %v1325_v27 = vpop.f32.mrf.mxu2 }
 0x26f   : > { %1078 = vmatmul.bf16.gmra.mxu1 %v857_v26  ;;  %v1326_v32 = vadd.f32 %v1325_v27, %v2494_v0  ;;  %v1136_v36 = vmax.f32 %v1040_v31, 0.0 }
 0x270   : > { %v754_v28 = vpop.f32.mrf.mxu0  ;;  %v1613_v29 = vpop.f32.mrf.mxu3 }
 0x271   : > { %v1614_v30 = vadd.f32 %v2565_v10, %v1613_v29  ;;  %v755_v37 = vadd.f32 %v754_v28, %v2350_v21  ;;  %v1449_v41 = vmax.f32 %v1326_v32, 0.0 }
 0x273   : > { %1765 = vst.msk [vmem:[%s2570_s20 + $0x30] sm:$0xff] %vm1758_vm1, %v1614_v30  ;;  %v824_v48 = vmax.f32 %v755_v37, 0.0 }
 0x274   : > { %v1041_v33 = vpop.f32.mrf.mxu1 }
 0x275   : > { %v1042_v34 = vadd.f32 %v1041_v33, %v2412_v39 }
 0x276   : > { %v1327_v35 = vpop.f32.mrf.mxu2 }
 0x277   : > { %v1137_v38 = vmax.f32 %v1042_v34, 0.0  ;;  %v1328_v40 = vadd.f32 %v1327_v35, %v2494_v0 }
 0x278   : > { %v756_v42 = vpop.f32.mrf.mxu0  ;;  %v1615_v43 = vpop.f32.mrf.mxu3 }
 0x279   : > { %v1179_v44 = vpack.c.bf16 %v1137_v38, %v1136_v36  ;;  %v1450_v45 = vmax.f32 %v1328_v40, 0.0  ;;  %v757_v46 = vadd.f32 %v756_v42, %v2350_v21  ;;  %v1616_v47 = vadd.f32 %v2565_v10, %v1615_v43 }
 0x27b   : > { %v825_v49 = vmax.f32 %v757_v46, 0.0  ;;  %1766 = vst.msk [vmem:[%s2570_s20 + $0x38] sm:$0xff] %vm1758_vm1, %v1616_v47  ;;  %1369 = vmatmul.bf16.gmra.mxu2 %v1179_v44  ;;  %v1501_v50 = vpack.c.bf16 %v1450_v45, %v1449_v41 }
 0x27c   : > { %v1044_v51 = vpop.f32.mrf.mxu1 }
 0x27d   : > { %v858_v52 = vpack.c.bf16 %v825_v49, %v824_v48  ;;  %1657 = vmatmul.bf16.gmra.mxu3 %v1501_v50  ;;  %v1045_v57 = vadd.f32 %v1044_v51, %v2412_v39 }
 0x27e   : > { %v1330_v53 = vpop.f32.mrf.mxu2 }
 0x27f   : > { %1083 = vmatmul.bf16.gmra.mxu1 %v858_v52  ;;  %v1331_v58 = vadd.f32 %v1330_v53, %v2494_v0  ;;  %v1138_v62 = vmax.f32 %v1045_v57, 0.0 }
 0x280   : > { %v759_v54 = vpop.f32.mrf.mxu0  ;;  %v1618_v55 = vpop.f32.mrf.mxu3 }
 0x281   : > { %v1619_v56 = vadd.f32 %v2565_v10, %v1618_v55  ;;  %v760_v63 = vadd.f32 %v759_v54, %v2350_v21  ;;  %v1451_v3 = vmax.f32 %v1331_v58, 0.0 }
 0x283   : > { %1767 = vst.msk [vmem:[%s2570_s20 + $0x40] sm:$0xff] %vm1758_vm1, %v1619_v56  ;;  %v826_v19 = vmax.f32 %v760_v63, 0.0 }
 0x284   : > { %v1046_v59 = vpop.f32.mrf.mxu1 }
 0x285   : > { %v1047_v60 = vadd.f32 %v1046_v59, %v2412_v39 }
 0x286   : > { %v1332_v61 = vpop.f32.mrf.mxu2 }
 0x287   : > { %v1139_v1 = vmax.f32 %v1047_v60, 0.0  ;;  %v1333_v2 = vadd.f32 %v1332_v61, %v2494_v0 }
 0x288   : > { %v761_v4 = vpop.f32.mrf.mxu0  ;;  %v1620_v5 = vpop.f32.mrf.mxu3 }
 0x289   : > { %v1180_v6 = vpack.c.bf16 %v1139_v1, %v1138_v62  ;;  %v1452_v7 = vmax.f32 %v1333_v2, 0.0  ;;  %v762_v8 = vadd.f32 %v761_v4, %v2350_v21  ;;  %v1621_v9 = vadd.f32 %v2565_v10, %v1620_v5 }
 0x28b   : > { %v827_v11 = vmax.f32 %v762_v8, 0.0  ;;  %1768 = vst.msk [vmem:[%s2570_s20 + $0x48] sm:$0xff] %vm1758_vm1, %v1621_v9  ;;  %1374 = vmatmul.bf16.gmra.mxu2 %v1180_v6  ;;  %v1502_v12 = vpack.c.bf16 %v1452_v7, %v1451_v3 }
 0x28c   : > { %v1049_v13 = vpop.f32.mrf.mxu1 }
 0x28d   : > { %v859_v14 = vpack.c.bf16 %v827_v11, %v826_v19  ;;  %1662 = vmatmul.bf16.gmra.mxu3 %v1502_v12  ;;  %v1050_v18 = vadd.f32 %v1049_v13, %v2412_v39 }
 0x28e   : > { %v1335_v15 = vpop.f32.mrf.mxu2 }
 0x28f   : > { %1088 = vmatmul.bf16.gmra.mxu1 %v859_v14  ;;  %v1336_v20 = vadd.f32 %v1335_v15, %v2494_v0  ;;  %v1140_v24 = vmax.f32 %v1050_v18, 0.0 }
 0x290   : > { %v1623_v16 = vpop.f32.mrf.mxu3 }
 0x291   : > { %v1624_v17 = vadd.f32 %v2565_v10, %v1623_v16  ;;  %v1453_v28 = vmax.f32 %v1336_v20, 0.0 }
 0x293   : > { %1769 = vst.msk [vmem:[%s2570_s20 + $0x50] sm:$0xff] %vm1758_vm1, %v1624_v17 }
 0x294   : > { %v1051_v21 = vpop.f32.mrf.mxu1 }
 0x295   : > { %v1052_v22 = vadd.f32 %v1051_v21, %v2412_v39 }
 0x296   : > { %v1337_v23 = vpop.f32.mrf.mxu2 }
 0x297   : > { %v1141_v25 = vmax.f32 %v1052_v22, 0.0  ;;  %v1338_v26 = vadd.f32 %v1337_v23, %v2494_v0 }
 0x298   : > { %v1625_v27 = vpop.f32.mrf.mxu3 }
 0x299   : > { %v1181_v29 = vpack.c.bf16 %v1141_v25, %v1140_v24  ;;  %v1454_v30 = vmax.f32 %v1338_v26, 0.0  ;;  %v1626_v31 = vadd.f32 %v2565_v10, %v1625_v27 }
 0x29b   : > { %1770 = vst.msk [vmem:[%s2570_s20 + $0x58] sm:$0xff] %vm1758_vm1, %v1626_v31  ;;  %1379 = vmatmul.bf16.gmra.mxu2 %v1181_v29  ;;  %v1503_v32 = vpack.c.bf16 %v1454_v30, %v1453_v28 }
 0x29c   : > { %v1054_v33 = vpop.f32.mrf.mxu1 }
 0x29d   : > { %1667 = vmatmul.bf16.gmra.mxu3 %v1503_v32  ;;  %v1055_v37 = vadd.f32 %v1054_v33, %v2412_v39 }
 0x29e   : > { %v1340_v34 = vpop.f32.mrf.mxu2 }
 0x29f   : > { %v1341_v40 = vadd.f32 %v1340_v34, %v2494_v0  ;;  %v1142_v43 = vmax.f32 %v1055_v37, 0.0 }
 0x2a0   : > { %v1628_v35 = vpop.f32.mrf.mxu3 }
 0x2a1   : > { %v1629_v36 = vadd.f32 %v2565_v10, %v1628_v35  ;;  %v1455_v47 = vmax.f32 %v1341_v40, 0.0 }
 0x2a3   : > { %1771 = vst.msk [vmem:[%s2570_s20 + $0x60] sm:$0xff] %vm1758_vm1, %v1629_v36 }
 0x2a4   : > { %v1056_v38 = vpop.f32.mrf.mxu1 }
 0x2a5   : > { %v1057_v41 = vadd.f32 %v1056_v38, %v2412_v39 }
 0x2a6   : > { %v1342_v42 = vpop.f32.mrf.mxu2 }
 0x2a7   : > { %v1143_v44 = vmax.f32 %v1057_v41, 0.0  ;;  %v1343_v45 = vadd.f32 %v1342_v42, %v2494_v0 }
 0x2a8   : > { %v1630_v46 = vpop.f32.mrf.mxu3 }
 0x2a9   : > { %v1182_v48 = vpack.c.bf16 %v1143_v44, %v1142_v43  ;;  %v1456_v49 = vmax.f32 %v1343_v45, 0.0  ;;  %v1631_v50 = vadd.f32 %v2565_v10, %v1630_v46 }
 0x2ab   : > { %1772 = vst.msk [vmem:[%s2570_s20 + $0x68] sm:$0xff] %vm1758_vm1, %v1631_v50  ;;  %1384 = vmatmul.bf16.gmra.mxu2 %v1182_v48  ;;  %v1504_v51 = vpack.c.bf16 %v1456_v49, %v1455_v47 }
 0x2ac   : > { %v1059_v52 = vpop.f32.mrf.mxu1 }
 0x2ad   : > { %1672 = vmatmul.bf16.gmra.mxu3 %v1504_v51  ;;  %v1060_v56 = vadd.f32 %v1059_v52, %v2412_v39 }
 0x2ae   : > { %v1345_v53 = vpop.f32.mrf.mxu2 }
 0x2af   : > { %v1346_v58 = vadd.f32 %v1345_v53, %v2494_v0  ;;  %v1144_v61 = vmax.f32 %v1060_v56, 0.0 }
 0x2b0   : > { %v1633_v54 = vpop.f32.mrf.mxu3 }
 0x2b1   : > { %v1634_v55 = vadd.f32 %v2565_v10, %v1633_v54  ;;  %v1457_v2 = vmax.f32 %v1346_v58, 0.0 }
 0x2b3   : > { %1773 = vst.msk [vmem:[%s2570_s20 + $0x70] sm:$0xff] %vm1758_vm1, %v1634_v55 }
 0x2b4   : > { %v1061_v57 = vpop.f32.mrf.mxu1 }
 0x2b5   : > { %v1062_v59 = vadd.f32 %v1061_v57, %v2412_v39 }
 0x2b6   : > { %v1347_v60 = vpop.f32.mrf.mxu2 }
 0x2b7   : > { %v1145_v62 = vmax.f32 %v1062_v59, 0.0  ;;  %v1348_v63 = vadd.f32 %v1347_v60, %v2494_v0 }
 0x2b8   : > { %v1635_v1 = vpop.f32.mrf.mxu3 }
 0x2b9   : > { %v1183_v3 = vpack.c.bf16 %v1145_v62, %v1144_v61  ;;  %v1458_v4 = vmax.f32 %v1348_v63, 0.0  ;;  %v1636_v5 = vadd.f32 %v2565_v10, %v1635_v1 }
 0x2bb   : > { %1774 = vst.msk [vmem:[%s2570_s20 + $0x78] sm:$0xff] %vm1758_vm1, %v1636_v5  ;;  %1389 = vmatmul.bf16.gmra.mxu2 %v1183_v3  ;;  %v1505_v6 = vpack.c.bf16 %v1458_v4, %v1457_v2 }
 0x2bc   : > { %v1064_v7 = vpop.f32.mrf.mxu1 }
 0x2bd   : > { %1677 = vmatmul.bf16.gmra.mxu3 %v1505_v6  ;;  %v1065_v11 = vadd.f32 %v1064_v7, %v2412_v39 }
 0x2be   : > { %v1350_v8 = vpop.f32.mrf.mxu2 }
 0x2bf   : > { %v1351_v13 = vadd.f32 %v1350_v8, %v2494_v0  ;;  %v1146_v16 = vmax.f32 %v1065_v11, 0.0 }
 0x2c0   : > { %v1638_v9 = vpop.f32.mrf.mxu3 }
 0x2c1   : > { %v1639_v19 = vadd.f32 %v2565_v10, %v1638_v9  ;;  %v1459_v20 = vmax.f32 %v1351_v13, 0.0 }
 0x2c3   : > { %1775 = vst.msk [vmem:[%s2570_s20 + $0x80] sm:$0xff] %vm1758_vm1, %v1639_v19 }
 0x2c4   : > { %v1066_v12 = vpop.f32.mrf.mxu1 }
 0x2c5   : > { %v1067_v14 = vadd.f32 %v1066_v12, %v2412_v39 }
 0x2c6   : > { %v1352_v15 = vpop.f32.mrf.mxu2 }
 0x2c7   : > { %v1147_v17 = vmax.f32 %v1067_v14, 0.0  ;;  %v1353_v18 = vadd.f32 %v1352_v15, %v2494_v0 }
 0x2c8   : > { %v1640_v21 = vpop.f32.mrf.mxu3 }
 0x2c9   : > { %v1184_v22 = vpack.c.bf16 %v1147_v17, %v1146_v16  ;;  %v1460_v23 = vmax.f32 %v1353_v18, 0.0  ;;  %v1641_v24 = vadd.f32 %v2565_v10, %v1640_v21 }
 0x2cb   : > { %1776 = vst.msk [vmem:[%s2570_s20 + $0x88] sm:$0xff] %vm1758_vm1, %v1641_v24  ;;  %1394 = vmatmul.bf16.gmra.mxu2 %v1184_v22  ;;  %v1506_v25 = vpack.c.bf16 %v1460_v23, %v1459_v20 }
 0x2cc   : > { %v1069_v26 = vpop.f32.mrf.mxu1 }
 0x2cd   : > { %1682 = vmatmul.bf16.gmra.mxu3 %v1506_v25  ;;  %v1070_v30 = vadd.f32 %v1069_v26, %v2412_v39 }
 0x2ce   : > { %v1355_v27 = vpop.f32.mrf.mxu2 }
 0x2cf   : > { %v1356_v32 = vadd.f32 %v1355_v27, %v2494_v0  ;;  %v1148_v35 = vmax.f32 %v1070_v30, 0.0 }
 0x2d0   : > { %v1643_v28 = vpop.f32.mrf.mxu3 }
 0x2d1   : > { %v1644_v29 = vadd.f32 %v2565_v10, %v1643_v28  ;;  %v1461_v40 = vmax.f32 %v1356_v32, 0.0 }
 0x2d3   : > { %1777 = vst.msk [vmem:[%s2570_s20 + $0x90] sm:$0xff] %vm1758_vm1, %v1644_v29 }
 0x2d4   : > { %v1071_v31 = vpop.f32.mrf.mxu1 }
 0x2d5   : > { %v1072_v33 = vadd.f32 %v1071_v31, %v2412_v39 }
 0x2d6   : > { %v1357_v34 = vpop.f32.mrf.mxu2 }
 0x2d7   : > { %v1149_v36 = vmax.f32 %v1072_v33, 0.0  ;;  %v1358_v37 = vadd.f32 %v1357_v34, %v2494_v0 }
 0x2d8   : > { %v1645_v38 = vpop.f32.mrf.mxu3 }
 0x2d9   : > { %v1185_v41 = vpack.c.bf16 %v1149_v36, %v1148_v35  ;;  %v1462_v42 = vmax.f32 %v1358_v37, 0.0  ;;  %v1646_v43 = vadd.f32 %v2565_v10, %v1645_v38 }
 0x2db   : > { %1778 = vst.msk [vmem:[%s2570_s20 + $0x98] sm:$0xff] %vm1758_vm1, %v1646_v43  ;;  %1399 = vmatmul.bf16.gmra.mxu2 %v1185_v41  ;;  %v1507_v44 = vpack.c.bf16 %v1462_v42, %v1461_v40 }
 0x2dc   : > { %v1074_v45 = vpop.f32.mrf.mxu1 }
 0x2dd   : > { %1687 = vmatmul.bf16.gmra.mxu3 %v1507_v44  ;;  %v1075_v49 = vadd.f32 %v1074_v45, %v2412_v39 }
 0x2de   : > { %v1360_v46 = vpop.f32.mrf.mxu2 }
 0x2df   : > { %v1361_v51 = vadd.f32 %v1360_v46, %v2494_v0  ;;  %v1150_v54 = vmax.f32 %v1075_v49, 0.0 }
 0x2e0   : > { %v1648_v47 = vpop.f32.mrf.mxu3 }
 0x2e1   : > { %v1649_v48 = vadd.f32 %v2565_v10, %v1648_v47  ;;  %v1463_v58 = vmax.f32 %v1361_v51, 0.0 }
 0x2e3   : > { %1779 = vst.msk [vmem:[%s2570_s20 + $0xa0] sm:$0xff] %vm1758_vm1, %v1649_v48 }
 0x2e4   : > { %v1076_v50 = vpop.f32.mrf.mxu1 }
 0x2e5   : > { %v1077_v52 = vadd.f32 %v1076_v50, %v2412_v39 }
 0x2e6   : > { %v1362_v53 = vpop.f32.mrf.mxu2 }
 0x2e7   : > { %v1151_v55 = vmax.f32 %v1077_v52, 0.0  ;;  %v1363_v56 = vadd.f32 %v1362_v53, %v2494_v0 }
 0x2e8   : > { %v1650_v57 = vpop.f32.mrf.mxu3 }
 0x2e9   : > { %v1186_v59 = vpack.c.bf16 %v1151_v55, %v1150_v54  ;;  %v1464_v60 = vmax.f32 %v1363_v56, 0.0  ;;  %v1651_v61 = vadd.f32 %v2565_v10, %v1650_v57 }
 0x2eb   : > { %1780 = vst.msk [vmem:[%s2570_s20 + $0xa8] sm:$0xff] %vm1758_vm1, %v1651_v61  ;;  %1404 = vmatmul.bf16.gmra.mxu2 %v1186_v59  ;;  %v1508_v62 = vpack.c.bf16 %v1464_v60, %v1463_v58 }
 0x2ec   : > { %v1079_v63 = vpop.f32.mrf.mxu1 }
 0x2ed   : > { %1692 = vmatmul.bf16.gmra.mxu3 %v1508_v62  ;;  %v1080_v4 = vadd.f32 %v1079_v63, %v2412_v39 }
 0x2ee   : > { %v1365_v1 = vpop.f32.mrf.mxu2 }
 0x2ef   : > { %v1366_v6 = vadd.f32 %v1365_v1, %v2494_v0  ;;  %v1152_v9 = vmax.f32 %v1080_v4, 0.0 }
 0x2f0   : > { %v1653_v2 = vpop.f32.mrf.mxu3 }
 0x2f1   : > { %v1654_v3 = vadd.f32 %v2565_v10, %v1653_v2  ;;  %v1465_v13 = vmax.f32 %v1366_v6, 0.0 }
 0x2f3   : > { %1781 = vst.msk [vmem:[%s2570_s20 + $0xb0] sm:$0xff] %vm1758_vm1, %v1654_v3 }
 0x2f4   : > { %v1081_v5 = vpop.f32.mrf.mxu1 }
 0x2f5   : > { %v1082_v7 = vadd.f32 %v1081_v5, %v2412_v39 }
 0x2f6   : > { %v1367_v8 = vpop.f32.mrf.mxu2 }
 0x2f7   : > { %v1153_v19 = vmax.f32 %v1082_v7, 0.0  ;;  %v1368_v11 = vadd.f32 %v1367_v8, %v2494_v0 }
 0x2f8   : > { %v1655_v12 = vpop.f32.mrf.mxu3 }
 0x2f9   : > { %v1187_v14 = vpack.c.bf16 %v1153_v19, %v1152_v9  ;;  %v1466_v15 = vmax.f32 %v1368_v11, 0.0  ;;  %v1656_v16 = vadd.f32 %v2565_v10, %v1655_v12 }
 0x2fb   : > { %v1509_v17 = vpack.c.bf16 %v1466_v15, %v1465_v13  ;;  %1782 = vst.msk [vmem:[%s2570_s20 + $0xb8] sm:$0xff] %vm1758_vm1, %v1656_v16  ;;  %1409 = vmatmul.bf16.gmra.mxu2 %v1187_v14 }
 0x2fc   : > { %v1084_v18 = vpop.f32.mrf.mxu1 }
 0x2fd   : > { %1697 = vmatmul.bf16.gmra.mxu3 %v1509_v17  ;;  %v1085_v23 = vadd.f32 %v1084_v18, %v2412_v39 }
 0x2fe   : > { %v1370_v21 = vpop.f32.mrf.mxu2 }
 0x2ff   : > { %v1371_v25 = vadd.f32 %v1370_v21, %v2494_v0  ;;  %v1154_v28 = vmax.f32 %v1085_v23, 0.0 }
 0x300   : > { %v1658_v20 = vpop.f32.mrf.mxu3 }
 0x301   : > { %v1659_v22 = vadd.f32 %v2565_v10, %v1658_v20  ;;  %v1467_v32 = vmax.f32 %v1371_v25, 0.0 }
 0x303   : > { %1783 = vst.msk [vmem:[%s2570_s20 + $0xc0] sm:$0xff] %vm1758_vm1, %v1659_v22 }
 0x304   : > { %v1086_v24 = vpop.f32.mrf.mxu1 }
 0x305   : > { %v1087_v26 = vadd.f32 %v1086_v24, %v2412_v39 }
 0x306   : > { %v1372_v27 = vpop.f32.mrf.mxu2 }
 0x307   : > { %v1155_v29 = vmax.f32 %v1087_v26, 0.0  ;;  %v1373_v30 = vadd.f32 %v1372_v27, %v2494_v0 }
 0x308   : > { %v1660_v31 = vpop.f32.mrf.mxu3 }
 0x309   : > { %v1188_v33 = vpack.c.bf16 %v1155_v29, %v1154_v28  ;;  %v1468_v34 = vmax.f32 %v1373_v30, 0.0  ;;  %v1661_v35 = vadd.f32 %v2565_v10, %v1660_v31 }
 0x30b   : > { %v1510_v36 = vpack.c.bf16 %v1468_v34, %v1467_v32  ;;  %1784 = vst.msk [vmem:[%s2570_s20 + $0xc8] sm:$0xff] %vm1758_vm1, %v1661_v35  ;;  %1414 = vmatmul.bf16.gmra.mxu2 %v1188_v33 }
 0x30c   : > { %v1089_v37 = vpop.f32.mrf.mxu1 }
 0x30d   : > { %1702 = vmatmul.bf16.gmra.mxu3 %v1510_v36  ;;  %v1090_v42 = vadd.f32 %v1089_v37, %v2412_v39 }
 0x30e   : > { %v1375_v38 = vpop.f32.mrf.mxu2 }
 0x30f   : > { %v1376_v44 = vadd.f32 %v1375_v38, %v2494_v0  ;;  %v1156_v47 = vmax.f32 %v1090_v42, 0.0 }
 0x310   : > { %v1663_v40 = vpop.f32.mrf.mxu3 }
 0x311   : > { %v1664_v41 = vadd.f32 %v2565_v10, %v1663_v40  ;;  %v1469_v51 = vmax.f32 %v1376_v44, 0.0 }
 0x313   : > { %1785 = vst.msk [vmem:[%s2570_s20 + $0xd0] sm:$0xff] %vm1758_vm1, %v1664_v41 }
 0x314   : > { %v1091_v43 = vpop.f32.mrf.mxu1 }
 0x315   : > { %v1092_v45 = vadd.f32 %v1091_v43, %v2412_v39 }
 0x316   : > { %v1377_v46 = vpop.f32.mrf.mxu2 }
 0x317   : > { %v1157_v48 = vmax.f32 %v1092_v45, 0.0  ;;  %v1378_v49 = vadd.f32 %v1377_v46, %v2494_v0 }
 0x318   : > { %v1665_v50 = vpop.f32.mrf.mxu3 }
 0x319   : > { %v1189_v52 = vpack.c.bf16 %v1157_v48, %v1156_v47  ;;  %v1470_v53 = vmax.f32 %v1378_v49, 0.0  ;;  %v1666_v54 = vadd.f32 %v2565_v10, %v1665_v50 }
 0x31b   : > { %v1511_v55 = vpack.c.bf16 %v1470_v53, %v1469_v51  ;;  %1786 = vst.msk [vmem:[%s2570_s20 + $0xd8] sm:$0xff] %vm1758_vm1, %v1666_v54  ;;  %1419 = vmatmul.bf16.gmra.mxu2 %v1189_v52 }
 0x31d   : > { %1707 = vmatmul.bf16.gmra.mxu3 %v1511_v55 }
 0x31e   : > { %v1380_v56 = vpop.f32.mrf.mxu2 }
 0x31f   : > { %v1381_v58 = vadd.f32 %v1380_v56, %v2494_v0 }
 0x320   : > { %v1668_v39 = vpop.f32.mrf.mxu3 }
 0x321   : > { %v1669_v57 = vadd.f32 %v2565_v10, %v1668_v39  ;;  %v1471_v62 = vmax.f32 %v1381_v58, 0.0 }
 0x323   : > { %1787 = vst.msk [vmem:[%s2570_s20 + $0xe0] sm:$0xff] %vm1758_vm1, %v1669_v57 }
 0x326   : > { %v1382_v59 = vpop.f32.mrf.mxu2 }
 0x327   : > { %v1383_v60 = vadd.f32 %v1382_v59, %v2494_v0 }
 0x328   : > { %v1670_v61 = vpop.f32.mrf.mxu3 }
 0x329   : > { %v1472_v63 = vmax.f32 %v1383_v60, 0.0  ;;  %v1671_v1 = vadd.f32 %v2565_v10, %v1670_v61 }
 0x32b   : > { %v1512_v2 = vpack.c.bf16 %v1472_v63, %v1471_v62  ;;  %1788 = vst.msk [vmem:[%s2570_s20 + $0xe8] sm:$0xff] %vm1758_vm1, %v1671_v1 }
 0x32d   : > { %1712 = vmatmul.bf16.gmra.mxu3 %v1512_v2 }
 0x32e   : > { %v1385_v3 = vpop.f32.mrf.mxu2 }
 0x32f   : > { %v1386_v6 = vadd.f32 %v1385_v3, %v2494_v0 }
 0x330   : > { %v1673_v4 = vpop.f32.mrf.mxu3 }
 0x331   : > { %v1674_v5 = vadd.f32 %v2565_v10, %v1673_v4  ;;  %v1473_v19 = vmax.f32 %v1386_v6, 0.0 }
 0x333   : > { %1789 = vst.msk [vmem:[%s2570_s20 + $0xf0] sm:$0xff] %vm1758_vm1, %v1674_v5 }
 0x336   : > { %v1387_v7 = vpop.f32.mrf.mxu2 }
 0x337   : > { %v1388_v8 = vadd.f32 %v1387_v7, %v2494_v0 }
 0x338   : > { %v1675_v9 = vpop.f32.mrf.mxu3 }
 0x339   : > { %v1474_v11 = vmax.f32 %v1388_v8, 0.0  ;;  %v1676_v12 = vadd.f32 %v2565_v10, %v1675_v9 }
 0x33b   : > { %v1513_v13 = vpack.c.bf16 %v1474_v11, %v1473_v19  ;;  %1790 = vst.msk [vmem:[%s2570_s20 + $0xf8] sm:$0xff] %vm1758_vm1, %v1676_v12 }
 0x33d   : > { %1717 = vmatmul.bf16.gmra.mxu3 %v1513_v13 }
 0x33e   : > { %v1390_v14 = vpop.f32.mrf.mxu2 }
 0x33f   : > { %v1391_v17 = vadd.f32 %v1390_v14, %v2494_v0 }
 0x340   : > { %v1678_v15 = vpop.f32.mrf.mxu3 }
 0x341   : > { %v1679_v16 = vadd.f32 %v2565_v10, %v1678_v15  ;;  %v1475_v22 = vmax.f32 %v1391_v17, 0.0 }
 0x343   : > { %1791 = vst.msk [vmem:[%s2570_s20 + $0x100] sm:$0xff] %vm1758_vm1, %v1679_v16 }
 0x346   : > { %v1392_v18 = vpop.f32.mrf.mxu2 }
 0x347   : > { %v1393_v21 = vadd.f32 %v1392_v18, %v2494_v0 }
 0x348   : > { %v1680_v20 = vpop.f32.mrf.mxu3 }
 0x349   : > { %v1476_v23 = vmax.f32 %v1393_v21, 0.0  ;;  %v1681_v24 = vadd.f32 %v2565_v10, %v1680_v20 }
 0x34b   : > { %v1514_v25 = vpack.c.bf16 %v1476_v23, %v1475_v22  ;;  %1792 = vst.msk [vmem:[%s2570_s20 + $0x108] sm:$0xff] %vm1758_vm1, %v1681_v24 }
 0x34d   : > { %1722 = vmatmul.bf16.gmra.mxu3 %v1514_v25 }
 0x34e   : > { %v1395_v26 = vpop.f32.mrf.mxu2 }
 0x34f   : > { %v1396_v29 = vadd.f32 %v1395_v26, %v2494_v0 }
 0x350   : > { %v1683_v27 = vpop.f32.mrf.mxu3 }
 0x351   : > { %v1684_v28 = vadd.f32 %v2565_v10, %v1683_v27  ;;  %v1477_v33 = vmax.f32 %v1396_v29, 0.0 }
 0x353   : > { %1793 = vst.msk [vmem:[%s2570_s20 + $0x110] sm:$0xff] %vm1758_vm1, %v1684_v28 }
 0x356   : > { %v1397_v30 = vpop.f32.mrf.mxu2 }
 0x357   : > { %v1398_v31 = vadd.f32 %v1397_v30, %v2494_v0 }
 0x358   : > { %v1685_v32 = vpop.f32.mrf.mxu3 }
 0x359   : > { %v1478_v34 = vmax.f32 %v1398_v31, 0.0  ;;  %v1686_v35 = vadd.f32 %v2565_v10, %v1685_v32 }
 0x35b   : > { %v1515_v36 = vpack.c.bf16 %v1478_v34, %v1477_v33  ;;  %1794 = vst.msk [vmem:[%s2570_s20 + $0x118] sm:$0xff] %vm1758_vm1, %v1686_v35 }
 0x35d   : > { %1727 = vmatmul.bf16.gmra.mxu3 %v1515_v36 }
 0x35e   : > { %v1400_v37 = vpop.f32.mrf.mxu2 }
 0x35f   : > { %v1401_v41 = vadd.f32 %v1400_v37, %v2494_v0 }
 0x360   : > { %v1688_v38 = vpop.f32.mrf.mxu3 }
 0x361   : > { %v1689_v40 = vadd.f32 %v2565_v10, %v1688_v38  ;;  %v1479_v45 = vmax.f32 %v1401_v41, 0.0 }
 0x363   : > { %1795 = vst.msk [vmem:[%s2570_s20 + $0x120] sm:$0xff] %vm1758_vm1, %v1689_v40 }
 0x366   : > { %v1402_v42 = vpop.f32.mrf.mxu2 }
 0x367   : > { %v1403_v43 = vadd.f32 %v1402_v42, %v2494_v0 }
 0x368   : > { %v1690_v44 = vpop.f32.mrf.mxu3 }
 0x369   : > { %v1480_v46 = vmax.f32 %v1403_v43, 0.0  ;;  %v1691_v47 = vadd.f32 %v2565_v10, %v1690_v44 }
 0x36b   : > { %v1516_v48 = vpack.c.bf16 %v1480_v46, %v1479_v45  ;;  %1796 = vst.msk [vmem:[%s2570_s20 + $0x128] sm:$0xff] %vm1758_vm1, %v1691_v47 }
 0x36d   : > { %1732 = vmatmul.bf16.gmra.mxu3 %v1516_v48 }
 0x36e   : > { %v1405_v49 = vpop.f32.mrf.mxu2 }
 0x36f   : > { %v1406_v52 = vadd.f32 %v1405_v49, %v2494_v0 }
 0x370   : > { %v1693_v50 = vpop.f32.mrf.mxu3 }
 0x371   : > { %v1694_v51 = vadd.f32 %v2565_v10, %v1693_v50  ;;  %v1481_v56 = vmax.f32 %v1406_v52, 0.0 }
 0x373   : > { %1797 = vst.msk [vmem:[%s2570_s20 + $0x130] sm:$0xff] %vm1758_vm1, %v1694_v51 }
 0x376   : > { %v1407_v53 = vpop.f32.mrf.mxu2 }
 0x377   : > { %v1408_v54 = vadd.f32 %v1407_v53, %v2494_v0 }
 0x378   : > { %v1695_v55 = vpop.f32.mrf.mxu3 }
 0x379   : > { %v1482_v39 = vmax.f32 %v1408_v54, 0.0  ;;  %v1696_v57 = vadd.f32 %v2565_v10, %v1695_v55  ;;  %v2237_v55 = vld [vmem:[%s2853_s5] ss:$0 sm:$0xff] }
 0x37b   : > { %v1517_v58 = vpack.c.bf16 %v1482_v39, %v1481_v56  ;;  %1798 = vst.msk [vmem:[%s2570_s20 + $0x138] sm:$0xff] %vm1758_vm1, %v1696_v57 }
 0x37d   : > { %1737 = vmatmul.bf16.gmra.mxu3 %v1517_v58 }
 0x37e   : > { %v1410_v59 = vpop.f32.mrf.mxu2 }
 0x37f   : > { %v1411_v62 = vadd.f32 %v1410_v59, %v2494_v0 }
 0x380   : > { %v1698_v60 = vpop.f32.mrf.mxu3 }
 0x381   : > { %v1699_v61 = vadd.f32 %v2565_v10, %v1698_v60  ;;  %v1483_v3 = vmax.f32 %v1411_v62, 0.0 }
 0x383   : > { %1799 = vst.msk [vmem:[%s2570_s20 + $0x140] sm:$0xff] %vm1758_vm1, %v1699_v61 }
 0x386   : > { %v1412_v63 = vpop.f32.mrf.mxu2 }
 0x387   : > { %v1413_v1 = vadd.f32 %v1412_v63, %v2494_v0 }
 0x388   : > { %v1700_v2 = vpop.f32.mrf.mxu3 }
 0x389   : > { %v1484_v4 = vmax.f32 %v1413_v1, 0.0  ;;  %v1701_v5 = vadd.f32 %v2565_v10, %v1700_v2 }
 0x38b   : > { %v1518_v6 = vpack.c.bf16 %v1484_v4, %v1483_v3  ;;  %1800 = vst.msk [vmem:[%s2570_s20 + $0x148] sm:$0xff] %vm1758_vm1, %v1701_v5 }
 0x38d   : > { %1742 = vmatmul.bf16.gmra.mxu3 %v1518_v6 }
 0x38e   : > { %v1415_v7 = vpop.f32.mrf.mxu2 }
 0x38f   : > { %v1416_v19 = vadd.f32 %v1415_v7, %v2494_v0 }
 0x390   : > { %v1703_v8 = vpop.f32.mrf.mxu3 }
 0x391   : > { %v1704_v9 = vadd.f32 %v2565_v10, %v1703_v8  ;;  %v1485_v14 = vmax.f32 %v1416_v19, 0.0 }
 0x393   : > { %1801 = vst.msk [vmem:[%s2570_s20 + $0x150] sm:$0xff] %vm1758_vm1, %v1704_v9 }
 0x396   : > { %v1417_v11 = vpop.f32.mrf.mxu2 }
 0x397   : > { %v1418_v12 = vadd.f32 %v1417_v11, %v2494_v0 }
 0x398   : > { %v1705_v13 = vpop.f32.mrf.mxu3 }
 0x399   : > { %v1486_v15 = vmax.f32 %v1418_v12, 0.0  ;;  %v1706_v16 = vadd.f32 %v2565_v10, %v1705_v13 }
 0x39b   : > { %v1519_v17 = vpack.c.bf16 %v1486_v15, %v1485_v14  ;;  %1802 = vst.msk [vmem:[%s2570_s20 + $0x158] sm:$0xff] %vm1758_vm1, %v1706_v16 }
 0x39d   : > { %1747 = vmatmul.bf16.gmra.mxu3 %v1519_v17 }
 0x39e   : > { %v1420_v18 = vpop.f32.mrf.mxu2 }
 0x39f   : > { %v1421_v22 = vadd.f32 %v1420_v18, %v2494_v0 }
 0x3a0   : > { %v1708_v21 = vpop.f32.mrf.mxu3 }
 0x3a1   : > { %v1709_v20 = vadd.f32 %v2565_v10, %v1708_v21  ;;  %v1487_v26 = vmax.f32 %v1421_v22, 0.0 }
 0x3a3   : > { %1803 = vst.msk [vmem:[%s2570_s20 + $0x160] sm:$0xff] %vm1758_vm1, %v1709_v20 }
 0x3a6   : > { %v1422_v23 = vpop.f32.mrf.mxu2 }
 0x3a7   : > { %v1423_v24 = vadd.f32 %v1422_v23, %v2494_v0 }
 0x3a8   : > { %v1710_v25 = vpop.f32.mrf.mxu3 }
 0x3a9   : > { %v1488_v27 = vmax.f32 %v1423_v24, 0.0  ;;  %v1711_v28 = vadd.f32 %v2565_v10, %v1710_v25 }
 0x3ab   : > { %v1520_v29 = vpack.c.bf16 %v1488_v27, %v1487_v26  ;;  %1804 = vst.msk [vmem:[%s2570_s20 + $0x168] sm:$0xff] %vm1758_vm1, %v1711_v28 }
 0x3ad   : > { %1752 = vmatmul.bf16.gmra.mxu3 %v1520_v29 }
 0x3b0   : > { %v1713_v30 = vpop.f32.mrf.mxu3 }
 0x3b1   : > { %v1714_v31 = vadd.f32 %v2565_v10, %v1713_v30 }
 0x3b3   : > { %1805 = vst.msk [vmem:[%s2570_s20 + $0x170] sm:$0xff] %vm1758_vm1, %v1714_v31 }
 0x3b8   : > { %v1715_v32 = vpop.f32.mrf.mxu3 }
 0x3b9   : > { %v1716_v0 = vadd.f32 %v2565_v10, %v1715_v32 }
 0x3bb   : > { %1806 = vst.msk [vmem:[%s2570_s20 + $0x178] sm:$0xff] %vm1758_vm1, %v1716_v0 }
 0x3c0   : > { %v1718_v33 = vpop.f32.mrf.mxu3 }
 0x3c1   : > { %v1719_v34 = vadd.f32 %v2565_v10, %v1718_v33 }
 0x3c3   : > { %1807 = vst.msk [vmem:[%s2570_s20 + $0x180] sm:$0xff] %vm1758_vm1, %v1719_v34 }
 0x3c8   : > { %v1720_v35 = vpop.f32.mrf.mxu3 }
 0x3c9   : > { %v1721_v36 = vadd.f32 %v2565_v10, %v1720_v35 }
 0x3cb   : > { %1808 = vst.msk [vmem:[%s2570_s20 + $0x188] sm:$0xff] %vm1758_vm1, %v1721_v36 }
 0x3d0   : > { %v1723_v37 = vpop.f32.mrf.mxu3 }
 0x3d1   : > { %v1724_v38 = vadd.f32 %v2565_v10, %v1723_v37 }
 0x3d3   : > { %1809 = vst.msk [vmem:[%s2570_s20 + $0x190] sm:$0xff] %vm1758_vm1, %v1724_v38 }
 0x3d8   : > { %v1725_v40 = vpop.f32.mrf.mxu3 }
 0x3d9   : > { %v1726_v41 = vadd.f32 %v2565_v10, %v1725_v40 }
 0x3db   : > { %1810 = vst.msk [vmem:[%s2570_s20 + $0x198] sm:$0xff] %vm1758_vm1, %v1726_v41 }
 0x3e0   : > { %v1728_v42 = vpop.f32.mrf.mxu3 }
 0x3e1   : > { %v1729_v43 = vadd.f32 %v2565_v10, %v1728_v42 }
 0x3e3   : > { %1811 = vst.msk [vmem:[%s2570_s20 + $0x1a0] sm:$0xff] %vm1758_vm1, %v1729_v43 }
 0x3e8   : > { %v1730_v44 = vpop.f32.mrf.mxu3 }
 0x3e9   : > { %v1731_v45 = vadd.f32 %v2565_v10, %v1730_v44 }
 0x3eb   : > { %1812 = vst.msk [vmem:[%s2570_s20 + $0x1a8] sm:$0xff] %vm1758_vm1, %v1731_v45 }
 0x3f0   : > { %v1733_v46 = vpop.f32.mrf.mxu3 }
 0x3f1   : > { %v1734_v47 = vadd.f32 %v2565_v10, %v1733_v46 }
 0x3f3   : > { %1813 = vst.msk [vmem:[%s2570_s20 + $0x1b0] sm:$0xff] %vm1758_vm1, %v1734_v47 }
 0x3f8   : > { %v1735_v48 = vpop.f32.mrf.mxu3 }
 0x3f9   : > { %v1736_v49 = vadd.f32 %v2565_v10, %v1735_v48 }
 0x3fb   : > { %1814 = vst.msk [vmem:[%s2570_s20 + $0x1b8] sm:$0xff] %vm1758_vm1, %v1736_v49 }
 0x400   : > { %v1738_v50 = vpop.f32.mrf.mxu3 }
 0x401   : > { %v1739_v51 = vadd.f32 %v2565_v10, %v1738_v50 }
 0x403   : > { %1815 = vst.msk [vmem:[%s2570_s20 + $0x1c0] sm:$0xff] %vm1758_vm1, %v1739_v51 }
 0x408   : > { %v1740_v52 = vpop.f32.mrf.mxu3 }
 0x409   : > { %v1741_v53 = vadd.f32 %v2565_v10, %v1740_v52 }
 0x40b   : > { %1816 = vst.msk [vmem:[%s2570_s20 + $0x1c8] sm:$0xff] %vm1758_vm1, %v1741_v53 }
 0x410   : > { %v1743_v54 = vpop.f32.mrf.mxu3 }
 0x411   : > { %v1744_v56 = vadd.f32 %v2237_v55, %v1743_v54 }
 0x413   : > { %1817 = vst.msk [vmem:[%s2570_s20 + $0x1d0] sm:$0xff] %vm1758_vm1, %v1744_v56 }
 0x418   : > { %v1745_v39 = vpop.f32.mrf.mxu3 }
 0x419   : > { %v1746_v57 = vadd.f32 %v2237_v55, %v1745_v39 }
 0x41b   : > { %1818 = vst.msk [vmem:[%s2570_s20 + $0x1d8] sm:$0xff] %vm1758_vm1, %v1746_v57 }
 0x420   : > { %v1748_v58 = vpop.f32.mrf.mxu3 }
 0x421   : > { %v1749_v59 = vadd.f32 %v2237_v55, %v1748_v58 }
 0x423   : > { %1819 = vst.msk [vmem:[%s2570_s20 + $0x1e0] sm:$0xff] %vm1758_vm1, %v1749_v59 }
 0x428   : > { %v1750_v10 = vpop.f32.mrf.mxu3 }
 0x429   : > { %v1751_v60 = vadd.f32 %v2237_v55, %v1750_v10 }
 0x42b   : > { %1820 = vst.msk [vmem:[%s2570_s20 + $0x1e8] sm:$0xff] %vm1758_vm1, %v1751_v60 }
 0x430   : > { %v1753_v61 = vpop.f32.mrf.mxu3 }
 0x431   : > { %v1754_v62 = vadd.f32 %v2237_v55, %v1753_v61 }
 0x433   : > { %1821 = vst.msk [vmem:[%s2570_s20 + $0x1f0] sm:$0xff] %vm1758_vm1, %v1754_v62 }
 0x438   : > { %v1755_v63 = vpop.f32.mrf.mxu3 }
 0x439   : > { %v1756_v1 = vadd.f32 %v2237_v55, %v1755_v63 }
 0x43b   : > { %1822 = vst.msk [vmem:[%s2570_s20 + $0x1f8] sm:$0xff] %vm1758_vm1, %v1756_v1 }
 0x43c PF: > { %s16_s21 = sadd.s32 1, %s2244_s21  }
 0x43d   : > { %p13_p4 = scmp.ge.s32.totalorder %s16_s21, 4  }
 0x43f   :  { %15 = sbr.rel (!%p13_p4) target bundleno = 1 (0x1), region = 75 }

</bundles_post_ra>
